<compile_context>
chip_gen: v7x
topology: tpu7x:2x2x1
jax: 0.10.0
libtpu: 0.0.40
codegen_flags: <defaults>
</compile_context>

<pallas_src>
import functools

import jax
import jax.numpy as jnp
from jax.experimental import pallas as pl
from jax.experimental.pallas import tpu as pltpu

# Module hyper-parameters (from the PyTorch script)
BATCH_SIZE = 1
HIDDEN_SIZE = 5
INPUT_SIZE = 5
NUM_CLASS = 5
NUM_LAYERS = 2
SEQ_LEN = 6

GATE_PAD = 128  # each of the 4 gates gets its own 128-lane block


def _lstm2_kernel(x_ref, w0_ref, u0_ref, b0_ref, w1_ref, u1_ref, b1_ref,
                  y_ref, h0_ref, *, seq_len, batch, hidden, gp):
    """Fused 2-layer LSTM over the full sequence in one invocation.

    x_ref  : (S*B, Din)      input sequence (time-major rows)
    w0_ref : (Din, 4*gp)     layer-0 W_ih^T, gate-padded
    u0_ref : (H,   4*gp)     layer-0 W_hh^T, gate-padded
    b0_ref : (1,   4*gp)     layer-0 (b_ih + b_hh), gate-padded
    w1_ref : (H,   4*gp)     layer-1 W_ih^T, gate-padded
    u1_ref : (H,   4*gp)     layer-1 W_hh^T, gate-padded
    b1_ref : (1,   4*gp)     layer-1 (b_ih + b_hh), gate-padded
    y_ref  : (S*B, H)        layer-1 hidden sequence (module output)
    h0_ref : (S*B, H)        VMEM scratch: layer-0 hidden sequence
    """

    def run_layer(xg, u, out_ref):
        # xg: (S*B, 4*gp) — precomputed input projection + bias, gate-padded.
        # h/c kept at full 128-lane width; lanes >= hidden stay exactly 0.
        h = jnp.zeros((batch, gp), jnp.float32)
        c = jnp.zeros((batch, gp), jnp.float32)
        for t in range(seq_len):  # static trip count -> fully unrolled
            r0 = t * batch
            g = xg[r0:r0 + batch, :] + jnp.dot(
                h[:, :hidden], u, preferred_element_type=jnp.float32)
            # Gate order matches PyTorch: i, f, g, o — each in its own
            # 128-aligned lane block, so these slices are free vreg selects.
            i_g = jax.nn.sigmoid(g[:, 0 * gp:1 * gp])
            f_g = jax.nn.sigmoid(g[:, 1 * gp:2 * gp])
            g_g = jnp.tanh(g[:, 2 * gp:3 * gp])
            o_g = jax.nn.sigmoid(g[:, 3 * gp:4 * gp])
            c = f_g * c + i_g * g_g
            h = o_g * jnp.tanh(c)
            out_ref[pl.ds(r0, batch), :] = h[:, :hidden]

    # ---- layer 0: hoisted input projection, then unrolled recurrence ----
    xg0 = jnp.dot(x_ref[...], w0_ref[...],
                  preferred_element_type=jnp.float32) + b0_ref[...]
    run_layer(xg0, u0_ref[...], h0_ref)

    # ---- layer 1: consumes layer-0's sequence straight from VMEM scratch ----
    xg1 = jnp.dot(h0_ref[...], w1_ref[...],
                  preferred_element_type=jnp.float32) + b1_ref[...]
    run_layer(xg1, u1_ref[...], y_ref)


def lstm_forward(x, kernel_params):
    """Full 2-layer LSTM forward, matching the PyTorch module's forward().

    x             : (S, B, input_size) float32
    kernel_params : output of prepare_lstm_params (2 layers)
    returns       : (S*B, num_class) float32
    """
    seq_len, batch, in_dim = x.shape
    (w0, u0, b0), (w1, u1, b1) = kernel_params
    hidden = u0.shape[0]
    gp = w0.shape[1] // 4

    x2d = x.reshape(seq_len * batch, in_dim)

    kernel = functools.partial(_lstm2_kernel, seq_len=seq_len, batch=batch,
                               hidden=hidden, gp=gp)
    vmem_spec = pl.BlockSpec(memory_space=pltpu.MemorySpace.VMEM)

    out = pl.pallas_call(
        kernel,
        out_shape=jax.ShapeDtypeStruct((seq_len * batch, hidden), jnp.float32),
        in_specs=[vmem_spec] * 7,
        out_specs=vmem_spec,
        scratch_shapes=[pltpu.VMEM((seq_len * batch, hidden), jnp.float32)],
    )(x2d, w0, u0, b0, w1, u1, b1)
    # hidden == num_class in this module, so `out` already is output.view(-1, num_class)
    return out


lstm_forward_jit = jax.jit(lstm_forward)


# ----------------------------- parameter prep ------------------------------

def init_lstm_params(key, input_size, hidden_size, num_layers):
    """Deterministic parameters matching nn.LSTM shapes (PyTorch layout)."""
    bound = 1.0 / jnp.sqrt(jnp.float32(hidden_size))
    params = []
    for layer in range(num_layers):
        in_dim = input_size if layer == 0 else hidden_size
        key, k1, k2, k3, k4 = jax.random.split(key, 5)
        w_ih = jax.random.uniform(k1, (4 * hidden_size, in_dim),
                                  jnp.float32, -bound, bound)
        w_hh = jax.random.uniform(k2, (4 * hidden_size, hidden_size),
                                  jnp.float32, -bound, bound)
        b_ih = jax.random.uniform(k3, (4 * hidden_size,),
                                  jnp.float32, -bound, bound)
        b_hh = jax.random.uniform(k4, (4 * hidden_size,),
                                  jnp.float32, -bound, bound)
        params.append((w_ih, w_hh, b_ih, b_hh))
    return params


def _pad_gate_matrix(w_t, hidden, gp):
    """(in_dim, 4*hidden) -> (in_dim, 4*gp): gate k in lanes [k*gp, k*gp+hidden)."""
    in_dim = w_t.shape[0]
    out = jnp.zeros((in_dim, 4 * gp), jnp.float32)
    for k in range(4):
        out = out.at[:, k * gp:k * gp + hidden].set(
            w_t[:, k * hidden:(k + 1) * hidden])
    return out


def _pad_gate_bias(b, hidden, gp):
    out = jnp.zeros((1, 4 * gp), jnp.float32)
    for k in range(4):
        out = out.at[:, k * gp:k * gp + hidden].set(
            b[None, k * hidden:(k + 1) * hidden])
    return out


def prepare_lstm_params(params, hidden, gp=GATE_PAD):
    """One-time prep: transpose, gate-pad, fuse biases (hoisted out of the call path)."""
    kparams = []
    for (w_ih, w_hh, b_ih, b_hh) in params:
        w = _pad_gate_matrix(w_ih.T.astype(jnp.float32), hidden, gp)
        u = _pad_gate_matrix(w_hh.T.astype(jnp.float32), hidden, gp)
        b = _pad_gate_bias((b_ih + b_hh).astype(jnp.float32), hidden, gp)
        kparams.append((w, u, b))
    return kparams


# ------------------------------- reference ---------------------------------

def _lstm_forward_ref(x, params, num_class):
    """Pure-JAX reference for correctness checking (PyTorch nn.LSTM semantics)."""
    seq_len, batch, _ = x.shape
    h_seq = x
    for (w_ih, w_hh, b_ih, b_hh) in params:
        hidden = w_hh.shape[1]
        h = jnp.zeros((batch, hidden), jnp.float32)
        c = jnp.zeros((batch, hidden), jnp.float32)
        outs = []
        for t in range(seq_len):
            gates = h_seq[t] @ w_ih.T + h @ w_hh.T + b_ih + b_hh
            i_g = jax.nn.sigmoid(gates[:, 0 * hidden:1 * hidden])
            f_g = jax.nn.sigmoid(gates[:, 1 * hidden:2 * hidden])
            g_g = jnp.tanh(gates[:, 2 * hidden:3 * hidden])
            o_g = jax.nn.sigmoid(gates[:, 3 * hidden:4 * hidden])
            c = f_g * c + i_g * g_g
            h = o_g * jnp.tanh(c)
            outs.append(h)
        h_seq = jnp.stack(outs, axis=0)
    return h_seq.reshape(-1, num_class)


if __name__ == "__main__":
    key = jax.random.PRNGKey(0)
    key, kx, kp = jax.random.split(key, 3)

    # Input: (seq_len, batch, input_size) — PyTorch nn.LSTM default layout.
    x = jax.random.normal(kx, (SEQ_LEN, BATCH_SIZE, INPUT_SIZE), jnp.float32)
    params = init_lstm_params(kp, INPUT_SIZE, HIDDEN_SIZE, NUM_LAYERS)

    # One-time parameter preparation (transpose / gate-pad / bias-fuse).
    kernel_params = prepare_lstm_params(params, HIDDEN_SIZE)
    kernel_params = jax.tree_util.tree_map(jax.block_until_ready, kernel_params)

    out = lstm_forward_jit(x, kernel_params)
    out = jax.block_until_ready(out)

    ref = _lstm_forward_ref(x, params, NUM_CLASS)
    assert out.shape == (SEQ_LEN * BATCH_SIZE, NUM_CLASS)
    assert jnp.allclose(out, ref, atol=1e-5, rtol=1e-5)

    print("KERNEL_OK")
</pallas_src>

<mosaic_0001>
module attributes {stable_mosaic.version = 11 : i64} {
  func.func @_lstm2_kernel(%arg0: memref<6x5xf32, #tpu.memory_space<vmem>>, %arg1: memref<5x512xf32, #tpu.memory_space<vmem>>, %arg2: memref<5x512xf32, #tpu.memory_space<vmem>>, %arg3: memref<1x512xf32, #tpu.memory_space<vmem>>, %arg4: memref<5x512xf32, #tpu.memory_space<vmem>>, %arg5: memref<5x512xf32, #tpu.memory_space<vmem>>, %arg6: memref<1x512xf32, #tpu.memory_space<vmem>>, %arg7: memref<6x5xf32, #tpu.memory_space<vmem>>, %arg8: memref<6x5xf32, #tpu.memory_space<vmem>>) attributes {dimension_semantics = [], scalar_prefetch = 0 : i64, scratch_operands = 1 : i64, tpu.core_type = #tpu.core_type<tc>} {
    %c0 = arith.constant 0 : index
    %c0_0 = arith.constant 0 : index
    %0 = vector.load %arg0[%c0, %c0_0] : memref<6x5xf32, #tpu.memory_space<vmem>>, vector<6x5xf32>
    %c0_1 = arith.constant 0 : index
    %c0_2 = arith.constant 0 : index
    %1 = vector.load %arg1[%c0_1, %c0_2] : memref<5x512xf32, #tpu.memory_space<vmem>>, vector<5x512xf32>
    %cst = arith.constant dense<0.000000e+00> : vector<6x512xf32>
    %2 = tpu.matmul %0, %1, %cst {dimension_numbers = #tpu.dot_dimension_numbers<[1], [0], [0], [1], [0, 0, 1, 1], [], []>} : vector<6x5xf32>, vector<5x512xf32>, vector<6x512xf32> -> vector<6x512xf32>
    %c0_3 = arith.constant 0 : index
    %c0_4 = arith.constant 0 : index
    %3 = vector.load %arg3[%c0_3, %c0_4] : memref<1x512xf32, #tpu.memory_space<vmem>>, vector<1x512xf32>
    %4 = vector.broadcast %3 : vector<1x512xf32> to vector<6x512xf32>
    %5 = arith.addf %2, %4 : vector<6x512xf32>
    %c0_5 = arith.constant 0 : index
    %c0_6 = arith.constant 0 : index
    %6 = vector.load %arg2[%c0_5, %c0_6] : memref<5x512xf32, #tpu.memory_space<vmem>>, vector<5x512xf32>
    %cst_7 = arith.constant 0.000000e+00 : f32
    %7 = vector.broadcast %cst_7 : f32 to vector<1x128xf32>
    %cst_8 = arith.constant 0.000000e+00 : f32
    %8 = vector.broadcast %cst_8 : f32 to vector<1x128xf32>
    %9 = vector.extract_strided_slice %5 {offsets = [0, 0], sizes = [1, 512], strides = [1, 1]} : vector<6x512xf32> to vector<1x512xf32>
    %10 = vector.extract_strided_slice %7 {offsets = [0, 0], sizes = [1, 5], strides = [1, 1]} : vector<1x128xf32> to vector<1x5xf32>
    %cst_9 = arith.constant dense<0.000000e+00> : vector<1x512xf32>
    %11 = tpu.matmul %10, %6, %cst_9 {dimension_numbers = #tpu.dot_dimension_numbers<[1], [0], [0], [1], [0, 0, 1, 1], [], []>} : vector<1x5xf32>, vector<5x512xf32>, vector<1x512xf32> -> vector<1x512xf32>
    %12 = arith.addf %9, %11 : vector<1x512xf32>
    %13 = vector.extract_strided_slice %12 {offsets = [0, 0], sizes = [1, 128], strides = [1, 1]} : vector<1x512xf32> to vector<1x128xf32>
    %14 = arith.negf %13 : vector<1x128xf32>
    %15 = math.exp %14 : vector<1x128xf32>
    %cst_10 = arith.constant 1.000000e+00 : f32
    %16 = vector.broadcast %cst_10 : f32 to vector<1x128xf32>
    %17 = arith.addf %16, %15 : vector<1x128xf32>
    %18 = arith.divf %16, %17 : vector<1x128xf32>
    %19 = vector.extract_strided_slice %12 {offsets = [0, 128], sizes = [1, 128], strides = [1, 1]} : vector<1x512xf32> to vector<1x128xf32>
    %20 = arith.negf %19 : vector<1x128xf32>
    %21 = math.exp %20 : vector<1x128xf32>
    %cst_11 = arith.constant 1.000000e+00 : f32
    %22 = vector.broadcast %cst_11 : f32 to vector<1x128xf32>
    %23 = arith.addf %22, %21 : vector<1x128xf32>
    %24 = arith.divf %22, %23 : vector<1x128xf32>
    %25 = vector.extract_strided_slice %12 {offsets = [0, 256], sizes = [1, 128], strides = [1, 1]} : vector<1x512xf32> to vector<1x128xf32>
    %26 = math.tanh %25 : vector<1x128xf32>
    %27 = vector.extract_strided_slice %12 {offsets = [0, 384], sizes = [1, 128], strides = [1, 1]} : vector<1x512xf32> to vector<1x128xf32>
    %28 = arith.negf %27 : vector<1x128xf32>
    %29 = math.exp %28 : vector<1x128xf32>
    %cst_12 = arith.constant 1.000000e+00 : f32
    %30 = vector.broadcast %cst_12 : f32 to vector<1x128xf32>
    %31 = arith.addf %30, %29 : vector<1x128xf32>
    %32 = arith.divf %30, %31 : vector<1x128xf32>
    %33 = arith.mulf %24, %8 : vector<1x128xf32>
    %34 = arith.mulf %18, %26 : vector<1x128xf32>
    %35 = arith.addf %33, %34 : vector<1x128xf32>
    %36 = math.tanh %35 : vector<1x128xf32>
    %37 = arith.mulf %32, %36 : vector<1x128xf32>
    %38 = vector.extract_strided_slice %37 {offsets = [0, 0], sizes = [1, 5], strides = [1, 1]} : vector<1x128xf32> to vector<1x5xf32>
    %c0_13 = arith.constant 0 : index
    %c0_14 = arith.constant 0 : index
    %39 = vector.load %arg8[%c0_13, %c0_14] : memref<6x5xf32, #tpu.memory_space<vmem>>, vector<1x5xf32>
    tpu.vector_store %arg8[%c0_13, %c0_14], %38 {strides = array<i32>} : memref<6x5xf32, #tpu.memory_space<vmem>>, vector<1x5xf32>,
    %40 = vector.extract_strided_slice %5 {offsets = [1, 0], sizes = [1, 512], strides = [1, 1]} : vector<6x512xf32> to vector<1x512xf32>
    %41 = vector.extract_strided_slice %37 {offsets = [0, 0], sizes = [1, 5], strides = [1, 1]} : vector<1x128xf32> to vector<1x5xf32>
    %cst_15 = arith.constant dense<0.000000e+00> : vector<1x512xf32>
    %42 = tpu.matmul %41, %6, %cst_15 {dimension_numbers = #tpu.dot_dimension_numbers<[1], [0], [0], [1], [0, 0, 1, 1], [], []>} : vector<1x5xf32>, vector<5x512xf32>, vector<1x512xf32> -> vector<1x512xf32>
    %43 = arith.addf %40, %42 : vector<1x512xf32>
    %44 = vector.extract_strided_slice %43 {offsets = [0, 0], sizes = [1, 128], strides = [1, 1]} : vector<1x512xf32> to vector<1x128xf32>
    %45 = arith.negf %44 : vector<1x128xf32>
    %46 = math.exp %45 : vector<1x128xf32>
    %cst_16 = arith.constant 1.000000e+00 : f32
    %47 = vector.broadcast %cst_16 : f32 to vector<1x128xf32>
    %48 = arith.addf %47, %46 : vector<1x128xf32>
    %49 = arith.divf %47, %48 : vector<1x128xf32>
    %50 = vector.extract_strided_slice %43 {offsets = [0, 128], sizes = [1, 128], strides = [1, 1]} : vector<1x512xf32> to vector<1x128xf32>
    %51 = arith.negf %50 : vector<1x128xf32>
    %52 = math.exp %51 : vector<1x128xf32>
    %cst_17 = arith.constant 1.000000e+00 : f32
    %53 = vector.broadcast %cst_17 : f32 to vector<1x128xf32>
    %54 = arith.addf %53, %52 : vector<1x128xf32>
    %55 = arith.divf %53, %54 : vector<1x128xf32>
    %56 = vector.extract_strided_slice %43 {offsets = [0, 256], sizes = [1, 128], strides = [1, 1]} : vector<1x512xf32> to vector<1x128xf32>
    %57 = math.tanh %56 : vector<1x128xf32>
    %58 = vector.extract_strided_slice %43 {offsets = [0, 384], sizes = [1, 128], strides = [1, 1]} : vector<1x512xf32> to vector<1x128xf32>
    %59 = arith.negf %58 : vector<1x128xf32>
    %60 = math.exp %59 : vector<1x128xf32>
    %cst_18 = arith.constant 1.000000e+00 : f32
    %61 = vector.broadcast %cst_18 : f32 to vector<1x128xf32>
    %62 = arith.addf %61, %60 : vector<1x128xf32>
    %63 = arith.divf %61, %62 : vector<1x128xf32>
    %64 = arith.mulf %55, %35 : vector<1x128xf32>
    %65 = arith.mulf %49, %57 : vector<1x128xf32>
    %66 = arith.addf %64, %65 : vector<1x128xf32>
    %67 = math.tanh %66 : vector<1x128xf32>
    %68 = arith.mulf %63, %67 : vector<1x128xf32>
    %69 = vector.extract_strided_slice %68 {offsets = [0, 0], sizes = [1, 5], strides = [1, 1]} : vector<1x128xf32> to vector<1x5xf32>
    %c1 = arith.constant 1 : index
    %c0_19 = arith.constant 0 : index
    %70 = vector.load %arg8[%c1, %c0_19] : memref<6x5xf32, #tpu.memory_space<vmem>>, vector<1x5xf32>
    tpu.vector_store %arg8[%c1, %c0_19], %69 {strides = array<i32>} : memref<6x5xf32, #tpu.memory_space<vmem>>, vector<1x5xf32>,
    %71 = vector.extract_strided_slice %5 {offsets = [2, 0], sizes = [1, 512], strides = [1, 1]} : vector<6x512xf32> to vector<1x512xf32>
    %72 = vector.extract_strided_slice %68 {offsets = [0, 0], sizes = [1, 5], strides = [1, 1]} : vector<1x128xf32> to vector<1x5xf32>
    %cst_20 = arith.constant dense<0.000000e+00> : vector<1x512xf32>
    %73 = tpu.matmul %72, %6, %cst_20 {dimension_numbers = #tpu.dot_dimension_numbers<[1], [0], [0], [1], [0, 0, 1, 1], [], []>} : vector<1x5xf32>, vector<5x512xf32>, vector<1x512xf32> -> vector<1x512xf32>
    %74 = arith.addf %71, %73 : vector<1x512xf32>
    %75 = vector.extract_strided_slice %74 {offsets = [0, 0], sizes = [1, 128], strides = [1, 1]} : vector<1x512xf32> to vector<1x128xf32>
    %76 = arith.negf %75 : vector<1x128xf32>
    %77 = math.exp %76 : vector<1x128xf32>
    %cst_21 = arith.constant 1.000000e+00 : f32
    %78 = vector.broadcast %cst_21 : f32 to vector<1x128xf32>
    %79 = arith.addf %78, %77 : vector<1x128xf32>
    %80 = arith.divf %78, %79 : vector<1x128xf32>
    %81 = vector.extract_strided_slice %74 {offsets = [0, 128], sizes = [1, 128], strides = [1, 1]} : vector<1x512xf32> to vector<1x128xf32>
    %82 = arith.negf %81 : vector<1x128xf32>
    %83 = math.exp %82 : vector<1x128xf32>
    %cst_22 = arith.constant 1.000000e+00 : f32
    %84 = vector.broadcast %cst_22 : f32 to vector<1x128xf32>
    %85 = arith.addf %84, %83 : vector<1x128xf32>
    %86 = arith.divf %84, %85 : vector<1x128xf32>
    %87 = vector.extract_strided_slice %74 {offsets = [0, 256], sizes = [1, 128], strides = [1, 1]} : vector<1x512xf32> to vector<1x128xf32>
    %88 = math.tanh %87 : vector<1x128xf32>
    %89 = vector.extract_strided_slice %74 {offsets = [0, 384], sizes = [1, 128], strides = [1, 1]} : vector<1x512xf32> to vector<1x128xf32>
    %90 = arith.negf %89 : vector<1x128xf32>
    %91 = math.exp %90 : vector<1x128xf32>
    %cst_23 = arith.constant 1.000000e+00 : f32
    %92 = vector.broadcast %cst_23 : f32 to vector<1x128xf32>
    %93 = arith.addf %92, %91 : vector<1x128xf32>
    %94 = arith.divf %92, %93 : vector<1x128xf32>
    %95 = arith.mulf %86, %66 : vector<1x128xf32>
    %96 = arith.mulf %80, %88 : vector<1x128xf32>
    %97 = arith.addf %95, %96 : vector<1x128xf32>
    %98 = math.tanh %97 : vector<1x128xf32>
    %99 = arith.mulf %94, %98 : vector<1x128xf32>
    %100 = vector.extract_strided_slice %99 {offsets = [0, 0], sizes = [1, 5], strides = [1, 1]} : vector<1x128xf32> to vector<1x5xf32>
    %c2 = arith.constant 2 : index
    %c0_24 = arith.constant 0 : index
    %101 = vector.load %arg8[%c2, %c0_24] : memref<6x5xf32, #tpu.memory_space<vmem>>, vector<1x5xf32>
    tpu.vector_store %arg8[%c2, %c0_24], %100 {strides = array<i32>} : memref<6x5xf32, #tpu.memory_space<vmem>>, vector<1x5xf32>,
    %102 = vector.extract_strided_slice %5 {offsets = [3, 0], sizes = [1, 512], strides = [1, 1]} : vector<6x512xf32> to vector<1x512xf32>
    %103 = vector.extract_strided_slice %99 {offsets = [0, 0], sizes = [1, 5], strides = [1, 1]} : vector<1x128xf32> to vector<1x5xf32>
    %cst_25 = arith.constant dense<0.000000e+00> : vector<1x512xf32>
    %104 = tpu.matmul %103, %6, %cst_25 {dimension_numbers = #tpu.dot_dimension_numbers<[1], [0], [0], [1], [0, 0, 1, 1], [], []>} : vector<1x5xf32>, vector<5x512xf32>, vector<1x512xf32> -> vector<1x512xf32>
    %105 = arith.addf %102, %104 : vector<1x512xf32>
    %106 = vector.extract_strided_slice %105 {offsets = [0, 0], sizes = [1, 128], strides = [1, 1]} : vector<1x512xf32> to vector<1x128xf32>
    %107 = arith.negf %106 : vector<1x128xf32>
    %108 = math.exp %107 : vector<1x128xf32>
    %cst_26 = arith.constant 1.000000e+00 : f32
    %109 = vector.broadcast %cst_26 : f32 to vector<1x128xf32>
    %110 = arith.addf %109, %108 : vector<1x128xf32>
    %111 = arith.divf %109, %110 : vector<1x128xf32>
    %112 = vector.extract_strided_slice %105 {offsets = [0, 128], sizes = [1, 128], strides = [1, 1]} : vector<1x512xf32> to vector<1x128xf32>
    %113 = arith.negf %112 : vector<1x128xf32>
    %114 = math.exp %113 : vector<1x128xf32>
    %cst_27 = arith.constant 1.000000e+00 : f32
    %115 = vector.broadcast %cst_27 : f32 to vector<1x128xf32>
    %116 = arith.addf %115, %114 : vector<1x128xf32>
    %117 = arith.divf %115, %116 : vector<1x128xf32>
    %118 = vector.extract_strided_slice %105 {offsets = [0, 256], sizes = [1, 128], strides = [1, 1]} : vector<1x512xf32> to vector<1x128xf32>
    %119 = math.tanh %118 : vector<1x128xf32>
    %120 = vector.extract_strided_slice %105 {offsets = [0, 384], sizes = [1, 128], strides = [1, 1]} : vector<1x512xf32> to vector<1x128xf32>
    %121 = arith.negf %120 : vector<1x128xf32>
    %122 = math.exp %121 : vector<1x128xf32>
    %cst_28 = arith.constant 1.000000e+00 : f32
    %123 = vector.broadcast %cst_28 : f32 to vector<1x128xf32>
    %124 = arith.addf %123, %122 : vector<1x128xf32>
    %125 = arith.divf %123, %124 : vector<1x128xf32>
    %126 = arith.mulf %117, %97 : vector<1x128xf32>
    %127 = arith.mulf %111, %119 : vector<1x128xf32>
    %128 = arith.addf %126, %127 : vector<1x128xf32>
    %129 = math.tanh %128 : vector<1x128xf32>
    %130 = arith.mulf %125, %129 : vector<1x128xf32>
    %131 = vector.extract_strided_slice %130 {offsets = [0, 0], sizes = [1, 5], strides = [1, 1]} : vector<1x128xf32> to vector<1x5xf32>
    %c3 = arith.constant 3 : index
    %c0_29 = arith.constant 0 : index
    %132 = vector.load %arg8[%c3, %c0_29] : memref<6x5xf32, #tpu.memory_space<vmem>>, vector<1x5xf32>
    tpu.vector_store %arg8[%c3, %c0_29], %131 {strides = array<i32>} : memref<6x5xf32, #tpu.memory_space<vmem>>, vector<1x5xf32>,
    %133 = vector.extract_strided_slice %5 {offsets = [4, 0], sizes = [1, 512], strides = [1, 1]} : vector<6x512xf32> to vector<1x512xf32>
    %134 = vector.extract_strided_slice %130 {offsets = [0, 0], sizes = [1, 5], strides = [1, 1]} : vector<1x128xf32> to vector<1x5xf32>
    %cst_30 = arith.constant dense<0.000000e+00> : vector<1x512xf32>
    %135 = tpu.matmul %134, %6, %cst_30 {dimension_numbers = #tpu.dot_dimension_numbers<[1], [0], [0], [1], [0, 0, 1, 1], [], []>} : vector<1x5xf32>, vector<5x512xf32>, vector<1x512xf32> -> vector<1x512xf32>
    %136 = arith.addf %133, %135 : vector<1x512xf32>
    %137 = vector.extract_strided_slice %136 {offsets = [0, 0], sizes = [1, 128], strides = [1, 1]} : vector<1x512xf32> to vector<1x128xf32>
    %138 = arith.negf %137 : vector<1x128xf32>
    %139 = math.exp %138 : vector<1x128xf32>
    %cst_31 = arith.constant 1.000000e+00 : f32
    %140 = vector.broadcast %cst_31 : f32 to vector<1x128xf32>
    %141 = arith.addf %140, %139 : vector<1x128xf32>
    %142 = arith.divf %140, %141 : vector<1x128xf32>
    %143 = vector.extract_strided_slice %136 {offsets = [0, 128], sizes = [1, 128], strides = [1, 1]} : vector<1x512xf32> to vector<1x128xf32>
    %144 = arith.negf %143 : vector<1x128xf32>
    %145 = math.exp %144 : vector<1x128xf32>
    %cst_32 = arith.constant 1.000000e+00 : f32
    %146 = vector.broadcast %cst_32 : f32 to vector<1x128xf32>
    %147 = arith.addf %146, %145 : vector<1x128xf32>
    %148 = arith.divf %146, %147 : vector<1x128xf32>
    %149 = vector.extract_strided_slice %136 {offsets = [0, 256], sizes = [1, 128], strides = [1, 1]} : vector<1x512xf32> to vector<1x128xf32>
    %150 = math.tanh %149 : vector<1x128xf32>
    %151 = vector.extract_strided_slice %136 {offsets = [0, 384], sizes = [1, 128], strides = [1, 1]} : vector<1x512xf32> to vector<1x128xf32>
    %152 = arith.negf %151 : vector<1x128xf32>
    %153 = math.exp %152 : vector<1x128xf32>
    %cst_33 = arith.constant 1.000000e+00 : f32
    %154 = vector.broadcast %cst_33 : f32 to vector<1x128xf32>
    %155 = arith.addf %154, %153 : vector<1x128xf32>
    %156 = arith.divf %154, %155 : vector<1x128xf32>
    %157 = arith.mulf %148, %128 : vector<1x128xf32>
    %158 = arith.mulf %142, %150 : vector<1x128xf32>
    %159 = arith.addf %157, %158 : vector<1x128xf32>
    %160 = math.tanh %159 : vector<1x128xf32>
    %161 = arith.mulf %156, %160 : vector<1x128xf32>
    %162 = vector.extract_strided_slice %161 {offsets = [0, 0], sizes = [1, 5], strides = [1, 1]} : vector<1x128xf32> to vector<1x5xf32>
    %c4 = arith.constant 4 : index
    %c0_34 = arith.constant 0 : index
    %163 = vector.load %arg8[%c4, %c0_34] : memref<6x5xf32, #tpu.memory_space<vmem>>, vector<1x5xf32>
    tpu.vector_store %arg8[%c4, %c0_34], %162 {strides = array<i32>} : memref<6x5xf32, #tpu.memory_space<vmem>>, vector<1x5xf32>,
    %164 = vector.extract_strided_slice %5 {offsets = [5, 0], sizes = [1, 512], strides = [1, 1]} : vector<6x512xf32> to vector<1x512xf32>
    %165 = vector.extract_strided_slice %161 {offsets = [0, 0], sizes = [1, 5], strides = [1, 1]} : vector<1x128xf32> to vector<1x5xf32>
    %cst_35 = arith.constant dense<0.000000e+00> : vector<1x512xf32>
    %166 = tpu.matmul %165, %6, %cst_35 {dimension_numbers = #tpu.dot_dimension_numbers<[1], [0], [0], [1], [0, 0, 1, 1], [], []>} : vector<1x5xf32>, vector<5x512xf32>, vector<1x512xf32> -> vector<1x512xf32>
    %167 = arith.addf %164, %166 : vector<1x512xf32>
    %168 = vector.extract_strided_slice %167 {offsets = [0, 0], sizes = [1, 128], strides = [1, 1]} : vector<1x512xf32> to vector<1x128xf32>
    %169 = arith.negf %168 : vector<1x128xf32>
    %170 = math.exp %169 : vector<1x128xf32>
    %cst_36 = arith.constant 1.000000e+00 : f32
    %171 = vector.broadcast %cst_36 : f32 to vector<1x128xf32>
    %172 = arith.addf %171, %170 : vector<1x128xf32>
    %173 = arith.divf %171, %172 : vector<1x128xf32>
    %174 = vector.extract_strided_slice %167 {offsets = [0, 128], sizes = [1, 128], strides = [1, 1]} : vector<1x512xf32> to vector<1x128xf32>
    %175 = arith.negf %174 : vector<1x128xf32>
    %176 = math.exp %175 : vector<1x128xf32>
    %cst_37 = arith.constant 1.000000e+00 : f32
    %177 = vector.broadcast %cst_37 : f32 to vector<1x128xf32>
    %178 = arith.addf %177, %176 : vector<1x128xf32>
    %179 = arith.divf %177, %178 : vector<1x128xf32>
    %180 = vector.extract_strided_slice %167 {offsets = [0, 256], sizes = [1, 128], strides = [1, 1]} : vector<1x512xf32> to vector<1x128xf32>
    %181 = math.tanh %180 : vector<1x128xf32>
    %182 = vector.extract_strided_slice %167 {offsets = [0, 384], sizes = [1, 128], strides = [1, 1]} : vector<1x512xf32> to vector<1x128xf32>
    %183 = arith.negf %182 : vector<1x128xf32>
    %184 = math.exp %183 : vector<1x128xf32>
    %cst_38 = arith.constant 1.000000e+00 : f32
    %185 = vector.broadcast %cst_38 : f32 to vector<1x128xf32>
    %186 = arith.addf %185, %184 : vector<1x128xf32>
    %187 = arith.divf %185, %186 : vector<1x128xf32>
    %188 = arith.mulf %179, %159 : vector<1x128xf32>
    %189 = arith.mulf %173, %181 : vector<1x128xf32>
    %190 = arith.addf %188, %189 : vector<1x128xf32>
    %191 = math.tanh %190 : vector<1x128xf32>
    %192 = arith.mulf %187, %191 : vector<1x128xf32>
    %193 = vector.extract_strided_slice %192 {offsets = [0, 0], sizes = [1, 5], strides = [1, 1]} : vector<1x128xf32> to vector<1x5xf32>
    %c5 = arith.constant 5 : index
    %c0_39 = arith.constant 0 : index
    %194 = vector.load %arg8[%c5, %c0_39] : memref<6x5xf32, #tpu.memory_space<vmem>>, vector<1x5xf32>
    tpu.vector_store %arg8[%c5, %c0_39], %193 {strides = array<i32>} : memref<6x5xf32, #tpu.memory_space<vmem>>, vector<1x5xf32>,
    %c0_40 = arith.constant 0 : index
    %c0_41 = arith.constant 0 : index
    %195 = vector.load %arg8[%c0_40, %c0_41] : memref<6x5xf32, #tpu.memory_space<vmem>>, vector<6x5xf32>
    %c0_42 = arith.constant 0 : index
    %c0_43 = arith.constant 0 : index
    %196 = vector.load %arg4[%c0_42, %c0_43] : memref<5x512xf32, #tpu.memory_space<vmem>>, vector<5x512xf32>
    %cst_44 = arith.constant dense<0.000000e+00> : vector<6x512xf32>
    %197 = tpu.matmul %195, %196, %cst_44 {dimension_numbers = #tpu.dot_dimension_numbers<[1], [0], [0], [1], [0, 0, 1, 1], [], []>} : vector<6x5xf32>, vector<5x512xf32>, vector<6x512xf32> -> vector<6x512xf32>
    %c0_45 = arith.constant 0 : index
    %c0_46 = arith.constant 0 : index
    %198 = vector.load %arg6[%c0_45, %c0_46] : memref<1x512xf32, #tpu.memory_space<vmem>>, vector<1x512xf32>
    %199 = vector.broadcast %198 : vector<1x512xf32> to vector<6x512xf32>
    %200 = arith.addf %197, %199 : vector<6x512xf32>
    %c0_47 = arith.constant 0 : index
    %c0_48 = arith.constant 0 : index
    %201 = vector.load %arg5[%c0_47, %c0_48] : memref<5x512xf32, #tpu.memory_space<vmem>>, vector<5x512xf32>
    %cst_49 = arith.constant 0.000000e+00 : f32
    %202 = vector.broadcast %cst_49 : f32 to vector<1x128xf32>
    %cst_50 = arith.constant 0.000000e+00 : f32
    %203 = vector.broadcast %cst_50 : f32 to vector<1x128xf32>
    %204 = vector.extract_strided_slice %200 {offsets = [0, 0], sizes = [1, 512], strides = [1, 1]} : vector<6x512xf32> to vector<1x512xf32>
    %205 = vector.extract_strided_slice %202 {offsets = [0, 0], sizes = [1, 5], strides = [1, 1]} : vector<1x128xf32> to vector<1x5xf32>
    %cst_51 = arith.constant dense<0.000000e+00> : vector<1x512xf32>
    %206 = tpu.matmul %205, %201, %cst_51 {dimension_numbers = #tpu.dot_dimension_numbers<[1], [0], [0], [1], [0, 0, 1, 1], [], []>} : vector<1x5xf32>, vector<5x512xf32>, vector<1x512xf32> -> vector<1x512xf32>
    %207 = arith.addf %204, %206 : vector<1x512xf32>
    %208 = vector.extract_strided_slice %207 {offsets = [0, 0], sizes = [1, 128], strides = [1, 1]} : vector<1x512xf32> to vector<1x128xf32>
    %209 = arith.negf %208 : vector<1x128xf32>
    %210 = math.exp %209 : vector<1x128xf32>
    %cst_52 = arith.constant 1.000000e+00 : f32
    %211 = vector.broadcast %cst_52 : f32 to vector<1x128xf32>
    %212 = arith.addf %211, %210 : vector<1x128xf32>
    %213 = arith.divf %211, %212 : vector<1x128xf32>
    %214 = vector.extract_strided_slice %207 {offsets = [0, 128], sizes = [1, 128], strides = [1, 1]} : vector<1x512xf32> to vector<1x128xf32>
    %215 = arith.negf %214 : vector<1x128xf32>
    %216 = math.exp %215 : vector<1x128xf32>
    %cst_53 = arith.constant 1.000000e+00 : f32
    %217 = vector.broadcast %cst_53 : f32 to vector<1x128xf32>
    %218 = arith.addf %217, %216 : vector<1x128xf32>
    %219 = arith.divf %217, %218 : vector<1x128xf32>
    %220 = vector.extract_strided_slice %207 {offsets = [0, 256], sizes = [1, 128], strides = [1, 1]} : vector<1x512xf32> to vector<1x128xf32>
    %221 = math.tanh %220 : vector<1x128xf32>
    %222 = vector.extract_strided_slice %207 {offsets = [0, 384], sizes = [1, 128], strides = [1, 1]} : vector<1x512xf32> to vector<1x128xf32>
    %223 = arith.negf %222 : vector<1x128xf32>
    %224 = math.exp %223 : vector<1x128xf32>
    %cst_54 = arith.constant 1.000000e+00 : f32
    %225 = vector.broadcast %cst_54 : f32 to vector<1x128xf32>
    %226 = arith.addf %225, %224 : vector<1x128xf32>
    %227 = arith.divf %225, %226 : vector<1x128xf32>
    %228 = arith.mulf %219, %203 : vector<1x128xf32>
    %229 = arith.mulf %213, %221 : vector<1x128xf32>
    %230 = arith.addf %228, %229 : vector<1x128xf32>
    %231 = math.tanh %230 : vector<1x128xf32>
    %232 = arith.mulf %227, %231 : vector<1x128xf32>
    %233 = vector.extract_strided_slice %232 {offsets = [0, 0], sizes = [1, 5], strides = [1, 1]} : vector<1x128xf32> to vector<1x5xf32>
    %c0_55 = arith.constant 0 : index
    %c0_56 = arith.constant 0 : index
    %234 = vector.load %arg7[%c0_55, %c0_56] : memref<6x5xf32, #tpu.memory_space<vmem>>, vector<1x5xf32>
    tpu.vector_store %arg7[%c0_55, %c0_56], %233 {strides = array<i32>} : memref<6x5xf32, #tpu.memory_space<vmem>>, vector<1x5xf32>,
    %235 = vector.extract_strided_slice %200 {offsets = [1, 0], sizes = [1, 512], strides = [1, 1]} : vector<6x512xf32> to vector<1x512xf32>
    %236 = vector.extract_strided_slice %232 {offsets = [0, 0], sizes = [1, 5], strides = [1, 1]} : vector<1x128xf32> to vector<1x5xf32>
    %cst_57 = arith.constant dense<0.000000e+00> : vector<1x512xf32>
    %237 = tpu.matmul %236, %201, %cst_57 {dimension_numbers = #tpu.dot_dimension_numbers<[1], [0], [0], [1], [0, 0, 1, 1], [], []>} : vector<1x5xf32>, vector<5x512xf32>, vector<1x512xf32> -> vector<1x512xf32>
    %238 = arith.addf %235, %237 : vector<1x512xf32>
    %239 = vector.extract_strided_slice %238 {offsets = [0, 0], sizes = [1, 128], strides = [1, 1]} : vector<1x512xf32> to vector<1x128xf32>
    %240 = arith.negf %239 : vector<1x128xf32>
    %241 = math.exp %240 : vector<1x128xf32>
    %cst_58 = arith.constant 1.000000e+00 : f32
    %242 = vector.broadcast %cst_58 : f32 to vector<1x128xf32>
    %243 = arith.addf %242, %241 : vector<1x128xf32>
    %244 = arith.divf %242, %243 : vector<1x128xf32>
    %245 = vector.extract_strided_slice %238 {offsets = [0, 128], sizes = [1, 128], strides = [1, 1]} : vector<1x512xf32> to vector<1x128xf32>
    %246 = arith.negf %245 : vector<1x128xf32>
    %247 = math.exp %246 : vector<1x128xf32>
    %cst_59 = arith.constant 1.000000e+00 : f32
    %248 = vector.broadcast %cst_59 : f32 to vector<1x128xf32>
    %249 = arith.addf %248, %247 : vector<1x128xf32>
    %250 = arith.divf %248, %249 : vector<1x128xf32>
    %251 = vector.extract_strided_slice %238 {offsets = [0, 256], sizes = [1, 128], strides = [1, 1]} : vector<1x512xf32> to vector<1x128xf32>
    %252 = math.tanh %251 : vector<1x128xf32>
    %253 = vector.extract_strided_slice %238 {offsets = [0, 384], sizes = [1, 128], strides = [1, 1]} : vector<1x512xf32> to vector<1x128xf32>
    %254 = arith.negf %253 : vector<1x128xf32>
    %255 = math.exp %254 : vector<1x128xf32>
    %cst_60 = arith.constant 1.000000e+00 : f32
    %256 = vector.broadcast %cst_60 : f32 to vector<1x128xf32>
    %257 = arith.addf %256, %255 : vector<1x128xf32>
    %258 = arith.divf %256, %257 : vector<1x128xf32>
    %259 = arith.mulf %250, %230 : vector<1x128xf32>
    %260 = arith.mulf %244, %252 : vector<1x128xf32>
    %261 = arith.addf %259, %260 : vector<1x128xf32>
    %262 = math.tanh %261 : vector<1x128xf32>
    %263 = arith.mulf %258, %262 : vector<1x128xf32>
    %264 = vector.extract_strided_slice %263 {offsets = [0, 0], sizes = [1, 5], strides = [1, 1]} : vector<1x128xf32> to vector<1x5xf32>
    %c1_61 = arith.constant 1 : index
    %c0_62 = arith.constant 0 : index
    %265 = vector.load %arg7[%c1_61, %c0_62] : memref<6x5xf32, #tpu.memory_space<vmem>>, vector<1x5xf32>
    tpu.vector_store %arg7[%c1_61, %c0_62], %264 {strides = array<i32>} : memref<6x5xf32, #tpu.memory_space<vmem>>, vector<1x5xf32>,
    %266 = vector.extract_strided_slice %200 {offsets = [2, 0], sizes = [1, 512], strides = [1, 1]} : vector<6x512xf32> to vector<1x512xf32>
    %267 = vector.extract_strided_slice %263 {offsets = [0, 0], sizes = [1, 5], strides = [1, 1]} : vector<1x128xf32> to vector<1x5xf32>
    %cst_63 = arith.constant dense<0.000000e+00> : vector<1x512xf32>
    %268 = tpu.matmul %267, %201, %cst_63 {dimension_numbers = #tpu.dot_dimension_numbers<[1], [0], [0], [1], [0, 0, 1, 1], [], []>} : vector<1x5xf32>, vector<5x512xf32>, vector<1x512xf32> -> vector<1x512xf32>
    %269 = arith.addf %266, %268 : vector<1x512xf32>
    %270 = vector.extract_strided_slice %269 {offsets = [0, 0], sizes = [1, 128], strides = [1, 1]} : vector<1x512xf32> to vector<1x128xf32>
    %271 = arith.negf %270 : vector<1x128xf32>
    %272 = math.exp %271 : vector<1x128xf32>
    %cst_64 = arith.constant 1.000000e+00 : f32
    %273 = vector.broadcast %cst_64 : f32 to vector<1x128xf32>
    %274 = arith.addf %273, %272 : vector<1x128xf32>
    %275 = arith.divf %273, %274 : vector<1x128xf32>
    %276 = vector.extract_strided_slice %269 {offsets = [0, 128], sizes = [1, 128], strides = [1, 1]} : vector<1x512xf32> to vector<1x128xf32>
    %277 = arith.negf %276 : vector<1x128xf32>
    %278 = math.exp %277 : vector<1x128xf32>
    %cst_65 = arith.constant 1.000000e+00 : f32
    %279 = vector.broadcast %cst_65 : f32 to vector<1x128xf32>
    %280 = arith.addf %279, %278 : vector<1x128xf32>
    %281 = arith.divf %279, %280 : vector<1x128xf32>
    %282 = vector.extract_strided_slice %269 {offsets = [0, 256], sizes = [1, 128], strides = [1, 1]} : vector<1x512xf32> to vector<1x128xf32>
    %283 = math.tanh %282 : vector<1x128xf32>
    %284 = vector.extract_strided_slice %269 {offsets = [0, 384], sizes = [1, 128], strides = [1, 1]} : vector<1x512xf32> to vector<1x128xf32>
    %285 = arith.negf %284 : vector<1x128xf32>
    %286 = math.exp %285 : vector<1x128xf32>
    %cst_66 = arith.constant 1.000000e+00 : f32
    %287 = vector.broadcast %cst_66 : f32 to vector<1x128xf32>
    %288 = arith.addf %287, %286 : vector<1x128xf32>
    %289 = arith.divf %287, %288 : vector<1x128xf32>
    %290 = arith.mulf %281, %261 : vector<1x128xf32>
    %291 = arith.mulf %275, %283 : vector<1x128xf32>
    %292 = arith.addf %290, %291 : vector<1x128xf32>
    %293 = math.tanh %292 : vector<1x128xf32>
    %294 = arith.mulf %289, %293 : vector<1x128xf32>
    %295 = vector.extract_strided_slice %294 {offsets = [0, 0], sizes = [1, 5], strides = [1, 1]} : vector<1x128xf32> to vector<1x5xf32>
    %c2_67 = arith.constant 2 : index
    %c0_68 = arith.constant 0 : index
    %296 = vector.load %arg7[%c2_67, %c0_68] : memref<6x5xf32, #tpu.memory_space<vmem>>, vector<1x5xf32>
    tpu.vector_store %arg7[%c2_67, %c0_68], %295 {strides = array<i32>} : memref<6x5xf32, #tpu.memory_space<vmem>>, vector<1x5xf32>,
    %297 = vector.extract_strided_slice %200 {offsets = [3, 0], sizes = [1, 512], strides = [1, 1]} : vector<6x512xf32> to vector<1x512xf32>
    %298 = vector.extract_strided_slice %294 {offsets = [0, 0], sizes = [1, 5], strides = [1, 1]} : vector<1x128xf32> to vector<1x5xf32>
    %cst_69 = arith.constant dense<0.000000e+00> : vector<1x512xf32>
    %299 = tpu.matmul %298, %201, %cst_69 {dimension_numbers = #tpu.dot_dimension_numbers<[1], [0], [0], [1], [0, 0, 1, 1], [], []>} : vector<1x5xf32>, vector<5x512xf32>, vector<1x512xf32> -> vector<1x512xf32>
    %300 = arith.addf %297, %299 : vector<1x512xf32>
    %301 = vector.extract_strided_slice %300 {offsets = [0, 0], sizes = [1, 128], strides = [1, 1]} : vector<1x512xf32> to vector<1x128xf32>
    %302 = arith.negf %301 : vector<1x128xf32>
    %303 = math.exp %302 : vector<1x128xf32>
    %cst_70 = arith.constant 1.000000e+00 : f32
    %304 = vector.broadcast %cst_70 : f32 to vector<1x128xf32>
    %305 = arith.addf %304, %303 : vector<1x128xf32>
    %306 = arith.divf %304, %305 : vector<1x128xf32>
    %307 = vector.extract_strided_slice %300 {offsets = [0, 128], sizes = [1, 128], strides = [1, 1]} : vector<1x512xf32> to vector<1x128xf32>
    %308 = arith.negf %307 : vector<1x128xf32>
    %309 = math.exp %308 : vector<1x128xf32>
    %cst_71 = arith.constant 1.000000e+00 : f32
    %310 = vector.broadcast %cst_71 : f32 to vector<1x128xf32>
    %311 = arith.addf %310, %309 : vector<1x128xf32>
    %312 = arith.divf %310, %311 : vector<1x128xf32>
    %313 = vector.extract_strided_slice %300 {offsets = [0, 256], sizes = [1, 128], strides = [1, 1]} : vector<1x512xf32> to vector<1x128xf32>
    %314 = math.tanh %313 : vector<1x128xf32>
    %315 = vector.extract_strided_slice %300 {offsets = [0, 384], sizes = [1, 128], strides = [1, 1]} : vector<1x512xf32> to vector<1x128xf32>
    %316 = arith.negf %315 : vector<1x128xf32>
    %317 = math.exp %316 : vector<1x128xf32>
    %cst_72 = arith.constant 1.000000e+00 : f32
    %318 = vector.broadcast %cst_72 : f32 to vector<1x128xf32>
    %319 = arith.addf %318, %317 : vector<1x128xf32>
    %320 = arith.divf %318, %319 : vector<1x128xf32>
    %321 = arith.mulf %312, %292 : vector<1x128xf32>
    %322 = arith.mulf %306, %314 : vector<1x128xf32>
    %323 = arith.addf %321, %322 : vector<1x128xf32>
    %324 = math.tanh %323 : vector<1x128xf32>
    %325 = arith.mulf %320, %324 : vector<1x128xf32>
    %326 = vector.extract_strided_slice %325 {offsets = [0, 0], sizes = [1, 5], strides = [1, 1]} : vector<1x128xf32> to vector<1x5xf32>
    %c3_73 = arith.constant 3 : index
    %c0_74 = arith.constant 0 : index
    %327 = vector.load %arg7[%c3_73, %c0_74] : memref<6x5xf32, #tpu.memory_space<vmem>>, vector<1x5xf32>
    tpu.vector_store %arg7[%c3_73, %c0_74], %326 {strides = array<i32>} : memref<6x5xf32, #tpu.memory_space<vmem>>, vector<1x5xf32>,
    %328 = vector.extract_strided_slice %200 {offsets = [4, 0], sizes = [1, 512], strides = [1, 1]} : vector<6x512xf32> to vector<1x512xf32>
    %329 = vector.extract_strided_slice %325 {offsets = [0, 0], sizes = [1, 5], strides = [1, 1]} : vector<1x128xf32> to vector<1x5xf32>
    %cst_75 = arith.constant dense<0.000000e+00> : vector<1x512xf32>
    %330 = tpu.matmul %329, %201, %cst_75 {dimension_numbers = #tpu.dot_dimension_numbers<[1], [0], [0], [1], [0, 0, 1, 1], [], []>} : vector<1x5xf32>, vector<5x512xf32>, vector<1x512xf32> -> vector<1x512xf32>
    %331 = arith.addf %328, %330 : vector<1x512xf32>
    %332 = vector.extract_strided_slice %331 {offsets = [0, 0], sizes = [1, 128], strides = [1, 1]} : vector<1x512xf32> to vector<1x128xf32>
    %333 = arith.negf %332 : vector<1x128xf32>
    %334 = math.exp %333 : vector<1x128xf32>
    %cst_76 = arith.constant 1.000000e+00 : f32
    %335 = vector.broadcast %cst_76 : f32 to vector<1x128xf32>
    %336 = arith.addf %335, %334 : vector<1x128xf32>
    %337 = arith.divf %335, %336 : vector<1x128xf32>
    %338 = vector.extract_strided_slice %331 {offsets = [0, 128], sizes = [1, 128], strides = [1, 1]} : vector<1x512xf32> to vector<1x128xf32>
    %339 = arith.negf %338 : vector<1x128xf32>
    %340 = math.exp %339 : vector<1x128xf32>
    %cst_77 = arith.constant 1.000000e+00 : f32
    %341 = vector.broadcast %cst_77 : f32 to vector<1x128xf32>
    %342 = arith.addf %341, %340 : vector<1x128xf32>
    %343 = arith.divf %341, %342 : vector<1x128xf32>
    %344 = vector.extract_strided_slice %331 {offsets = [0, 256], sizes = [1, 128], strides = [1, 1]} : vector<1x512xf32> to vector<1x128xf32>
    %345 = math.tanh %344 : vector<1x128xf32>
    %346 = vector.extract_strided_slice %331 {offsets = [0, 384], sizes = [1, 128], strides = [1, 1]} : vector<1x512xf32> to vector<1x128xf32>
    %347 = arith.negf %346 : vector<1x128xf32>
    %348 = math.exp %347 : vector<1x128xf32>
    %cst_78 = arith.constant 1.000000e+00 : f32
    %349 = vector.broadcast %cst_78 : f32 to vector<1x128xf32>
    %350 = arith.addf %349, %348 : vector<1x128xf32>
    %351 = arith.divf %349, %350 : vector<1x128xf32>
    %352 = arith.mulf %343, %323 : vector<1x128xf32>
    %353 = arith.mulf %337, %345 : vector<1x128xf32>
    %354 = arith.addf %352, %353 : vector<1x128xf32>
    %355 = math.tanh %354 : vector<1x128xf32>
    %356 = arith.mulf %351, %355 : vector<1x128xf32>
    %357 = vector.extract_strided_slice %356 {offsets = [0, 0], sizes = [1, 5], strides = [1, 1]} : vector<1x128xf32> to vector<1x5xf32>
    %c4_79 = arith.constant 4 : index
    %c0_80 = arith.constant 0 : index
    %358 = vector.load %arg7[%c4_79, %c0_80] : memref<6x5xf32, #tpu.memory_space<vmem>>, vector<1x5xf32>
    tpu.vector_store %arg7[%c4_79, %c0_80], %357 {strides = array<i32>} : memref<6x5xf32, #tpu.memory_space<vmem>>, vector<1x5xf32>,
    %359 = vector.extract_strided_slice %200 {offsets = [5, 0], sizes = [1, 512], strides = [1, 1]} : vector<6x512xf32> to vector<1x512xf32>
    %360 = vector.extract_strided_slice %356 {offsets = [0, 0], sizes = [1, 5], strides = [1, 1]} : vector<1x128xf32> to vector<1x5xf32>
    %cst_81 = arith.constant dense<0.000000e+00> : vector<1x512xf32>
    %361 = tpu.matmul %360, %201, %cst_81 {dimension_numbers = #tpu.dot_dimension_numbers<[1], [0], [0], [1], [0, 0, 1, 1], [], []>} : vector<1x5xf32>, vector<5x512xf32>, vector<1x512xf32> -> vector<1x512xf32>
    %362 = arith.addf %359, %361 : vector<1x512xf32>
    %363 = vector.extract_strided_slice %362 {offsets = [0, 0], sizes = [1, 128], strides = [1, 1]} : vector<1x512xf32> to vector<1x128xf32>
    %364 = arith.negf %363 : vector<1x128xf32>
    %365 = math.exp %364 : vector<1x128xf32>
    %cst_82 = arith.constant 1.000000e+00 : f32
    %366 = vector.broadcast %cst_82 : f32 to vector<1x128xf32>
    %367 = arith.addf %366, %365 : vector<1x128xf32>
    %368 = arith.divf %366, %367 : vector<1x128xf32>
    %369 = vector.extract_strided_slice %362 {offsets = [0, 128], sizes = [1, 128], strides = [1, 1]} : vector<1x512xf32> to vector<1x128xf32>
    %370 = arith.negf %369 : vector<1x128xf32>
    %371 = math.exp %370 : vector<1x128xf32>
    %cst_83 = arith.constant 1.000000e+00 : f32
    %372 = vector.broadcast %cst_83 : f32 to vector<1x128xf32>
    %373 = arith.addf %372, %371 : vector<1x128xf32>
    %374 = arith.divf %372, %373 : vector<1x128xf32>
    %375 = vector.extract_strided_slice %362 {offsets = [0, 256], sizes = [1, 128], strides = [1, 1]} : vector<1x512xf32> to vector<1x128xf32>
    %376 = math.tanh %375 : vector<1x128xf32>
    %377 = vector.extract_strided_slice %362 {offsets = [0, 384], sizes = [1, 128], strides = [1, 1]} : vector<1x512xf32> to vector<1x128xf32>
    %378 = arith.negf %377 : vector<1x128xf32>
    %379 = math.exp %378 : vector<1x128xf32>
    %cst_84 = arith.constant 1.000000e+00 : f32
    %380 = vector.broadcast %cst_84 : f32 to vector<1x128xf32>
    %381 = arith.addf %380, %379 : vector<1x128xf32>
    %382 = arith.divf %380, %381 : vector<1x128xf32>
    %383 = arith.mulf %374, %354 : vector<1x128xf32>
    %384 = arith.mulf %368, %376 : vector<1x128xf32>
    %385 = arith.addf %383, %384 : vector<1x128xf32>
    %386 = math.tanh %385 : vector<1x128xf32>
    %387 = arith.mulf %382, %386 : vector<1x128xf32>
    %388 = vector.extract_strided_slice %387 {offsets = [0, 0], sizes = [1, 5], strides = [1, 1]} : vector<1x128xf32> to vector<1x5xf32>
    %c5_85 = arith.constant 5 : index
    %c0_86 = arith.constant 0 : index
    %389 = vector.load %arg7[%c5_85, %c0_86] : memref<6x5xf32, #tpu.memory_space<vmem>>, vector<1x5xf32>
    tpu.vector_store %arg7[%c5_85, %c0_86], %388 {strides = array<i32>} : memref<6x5xf32, #tpu.memory_space<vmem>>, vector<1x5xf32>,
    return
  }
}

</mosaic_0001>

<bundles_post_ra>
// kernel: lstm_forward.1
= control target key start
LH: loop header
LB: loop body
LE: loop exit
PB: predicated region body
PF: predicated region fallthrough
CT: control target
= control target key end

     0   :  { %12 = vsyncpa [#allocation4], 0  ;;  %s3572_s0 = inlined_call_operand.vmem [shape: f32[6,5], index: 0, kind: input, shape index: {}]   ;;  %s3573_s1 = inlined_call_operand.hbm [shape: f32[5,512], index: 1, kind: input, shape index: {}]   ;;  %s3574_s2 = inlined_call_operand.hbm [shape: f32[5,512], index: 2, kind: input, shape index: {}]   ;;  %s3575_s3 = inlined_call_operand.hbm [shape: f32[1,512], index: 3, kind: input, shape index: {}]   ;;  %s3576_s4 = inlined_call_operand.hbm [shape: f32[5,512], index: 4, kind: input, shape index: {}]   ;;  %s3577_s5 = inlined_call_operand.vmem [shape: f32[5,512], index: 5, kind: input, shape index: {}]   ;;  %s3578_s6 = inlined_call_operand.vmem [shape: f32[1,512], index: 6, kind: input, shape index: {}]   ;;  %s3579_s7 = inlined_call_operand.hbm [shape: f32[6,5], index: 7, kind: output, shape index: {}]  }
   0x1   :  { %13 = vsyncpa [#allocation7], 0 }
   0x2   :  { %14 = vsyncpa [#allocation10], 0 }
   0x3   :  { %15 = vsyncpa [#allocation5], 0  ;;  %s3174_s24 = smov [#allocation6]   ;;  %s3175_s26 = smov [#allocation3]  }
   0x4   :  { %s34_s25 = sshll.u32 %s3174_s24, 4  ;;  %s24_s27 = sshll.u32 %s3175_s26, 4  ;;  %s35_s25 = int_to_ptr.vmem [resolvable:$true] %s34_s25  ;;  %s25_s27 = int_to_ptr.vmem [resolvable:$true] %s24_s27 }
   0x5   :  { %s3056_s30 = scalar_lea.hbm %s3574_s2, 512 }
   0x6   :  { %p3057_p0 = scmp.ne.s32.totalorder %s3574_s2, %s3056_s30  ;;  %p3060_p1 = scmp.lt.u32.totalorder %s3056_s30, %s3574_s2 }
   0x8   :  { %p3062_p2 = pnand %p3060_p1, %p3057_p0 }
   0xa   :  { %3065 = shalt.err (!%p3062_p2)
}
   0xb   :  { %s3066_s12 = scalar_lea.vmem %s35_s25, 512  ;;  %p3071_p4 = scmp.lt.s32.totalorder %s35_s25, %s35_s25 }
   0xc   :  { %p3067_p3 = scmp.ne.s32.totalorder %s35_s25, %s3066_s12  ;;  %p3072_p5 = scmp.lt.s32.totalorder %s3066_s12, %s3066_s12 }
   0xe   :  { %p3073_p6 = por %p3072_p5, %p3071_p4 }
  0x10   :  { %p3074_p7 = pnand %p3073_p6, %p3067_p3 }
  0x12   :  { %3077 = shalt.err (!%p3074_p7)
}
  0x13   :  { %37 = dma.hbm_to_vmem [thread:$0]  %s3574_s2, 512, %s35_s25, [#allocation7]  }
  0x14   :  { %s3078_s17 = scalar_lea.hbm %s3573_s1, 512 }
  0x15   :  { %p3079_p8 = scmp.ne.s32.totalorder %s3573_s1, %s3078_s17  ;;  %p3082_p9 = scmp.lt.u32.totalorder %s3078_s17, %s3573_s1 }
  0x17   :  { %p3084_p10 = pnand %p3082_p9, %p3079_p8 }
  0x19   :  { %3087 = shalt.err (!%p3084_p10)
}
  0x1a   :  { %s3088_s22 = scalar_lea.vmem %s25_s27, 512  ;;  %p3093_p12 = scmp.lt.s32.totalorder %s25_s27, %s25_s27 }
  0x1b   :  { %p3089_p11 = scmp.ne.s32.totalorder %s25_s27, %s3088_s22  ;;  %p3094_p13 = scmp.lt.s32.totalorder %s3088_s22, %s3088_s22 }
  0x1d   :  { %p3095_p0 = por %p3094_p13, %p3093_p12 }
  0x1f   :  { %p3096_p1 = pnand %p3095_p0, %p3089_p11 }
  0x21   :  { %3099 = shalt.err (!%p3096_p1)
}
  0x22   :  { %27 = dma.hbm_to_vmem [thread:$0]  %s3573_s1, 512, %s25_s27, [#allocation4]  }
  0x23   :  { %s3176_s24 = smov [#allocation8]   ;;  %s3177_s26 = smov [#allocation9]  }
  0x24   :  { %s44_s25 = sshll.u32 %s3176_s24, 4  ;;  %s54_s28 = sshll.u32 %s3177_s26, 4  ;;  %s45_s25 = int_to_ptr.vmem [resolvable:$true] %s44_s25  ;;  %s55_s28 = int_to_ptr.vmem [resolvable:$true] %s54_s28 }
  0x25   :  { %s3100_s8 = scalar_lea.hbm %s3575_s3, 64 }
  0x26   :  { %p3101_p2 = scmp.ne.s32.totalorder %s3575_s3, %s3100_s8  ;;  %p3104_p3 = scmp.lt.u32.totalorder %s3100_s8, %s3575_s3 }
  0x28   :  { %p3106_p4 = pnand %p3104_p3, %p3101_p2 }
  0x2a   :  { %3109 = shalt.err (!%p3106_p4)
}
  0x2b   :  { %s3110_s1 = scalar_lea.vmem %s45_s25, 64  ;;  %p3115_p6 = scmp.lt.s32.totalorder %s45_s25, %s45_s25 }
  0x2c   :  { %p3111_p5 = scmp.ne.s32.totalorder %s45_s25, %s3110_s1  ;;  %p3116_p7 = scmp.lt.s32.totalorder %s3110_s1, %s3110_s1 }
  0x2e   :  { %p3117_p8 = por %p3116_p7, %p3115_p6 }
  0x30   :  { %p3118_p9 = pnand %p3117_p8, %p3111_p5 }
  0x32   :  { %3121 = shalt.err (!%p3118_p9)
}
  0x33   :  { %47 = dma.hbm_to_vmem [thread:$0]  %s3575_s3, 64, %s45_s25, [#allocation7]  }
  0x34   :  { %s3122_s16 = scalar_lea.hbm %s3576_s4, 512 }
  0x35   :  { %p3123_p10 = scmp.ne.s32.totalorder %s3576_s4, %s3122_s16  ;;  %p3126_p11 = scmp.lt.u32.totalorder %s3122_s16, %s3576_s4 }
  0x37   :  { %p3128_p12 = pnand %p3126_p11, %p3123_p10 }
  0x39   :  { %3131 = shalt.err (!%p3128_p12)
}
  0x3a   :  { %s3132_s21 = scalar_lea.vmem %s55_s28, 512  ;;  %p3137_p0 = scmp.lt.s32.totalorder %s55_s28, %s55_s28 }
  0x3b   :  { %p3133_p13 = scmp.ne.s32.totalorder %s55_s28, %s3132_s21  ;;  %p3138_p1 = scmp.lt.s32.totalorder %s3132_s21, %s3132_s21 }
  0x3d   :  { %p3139_p2 = por %p3138_p1, %p3137_p0 }
  0x3f   :  { %p3140_p3 = pnand %p3139_p2, %p3133_p13 }
  0x41   :  { %3143 = shalt.err (!%p3140_p3)
}
  0x42   :  { %57 = dma.hbm_to_vmem [thread:$0]  %s3576_s4, 512, %s55_s28, [#allocation10]  }
  0x43   :  { %3166 = dma.done.wait [#allocation4], 512  }
  0x44   :  { %3167 = vsyncadd [#allocation4], 4294966784 }
  0x45   :  { %3168 = dma.done.wait [#allocation7], 576  }
  0x46   :  { %3169 = vsyncadd [#allocation7], 4294966720 }
  0x47   :  { %3170 = dma.done.wait [#allocation10], 512  }
  0x48   :  { %3171 = vsyncadd [#allocation10], 4294966784  ;;  %v3178_v0 = vmov 0.0   ;;  %vm105_vm0 = vcmask 1044480   ;;  %vm101_vm1 = vcmask 39936   ;;  %v81_v10 = vlaneseq }
  0x49   :  { %182 = vmatprep.mubr.f32.mxu0 %v3178_v0  ;;  %253 = vmatprep.mubr.f32.mxu1 %v3178_v0  ;;  %v76_v1 = vld [vmem:[#allocation3 + $0x8] sm:$0x1f]  ;;  %v75_v2 = vld [vmem:[#allocation3] sm:$0x1f]  ;;  %v74_v3 = vld [vmem:[%s3572_s0] sm:$0x3f] }
  0x4a   :  { %2742 = vmatprep.subr.msk.mxu0 %vm105_vm0, %v76_v1  ;;  %v3274_v4 = vld [vmem:[#allocation6 + $0x8] sm:$0x1f]  ;;  %v3276_v5 = vld [vmem:[#allocation6] sm:$0x1f]  ;;  %v78_v6 = vld [vmem:[#allocation3 + $0x18] sm:$0x1f] }
  0x4b   :  { %2743 = vmatpush1.msk.msra.mxu0 %vm105_vm0, %v75_v2  ;;  %2745 = vmatprep.subr.msk.mxu1 %vm105_vm0, %v78_v6  ;;  %v77_v7 = vld [vmem:[#allocation3 + $0x10] sm:$0x1f]  ;;  %v3283_v8 = vld [vmem:[#allocation6 + $0x18] sm:$0x1f]  ;;  %v3313_v11 = vshrl.u32 %v81_v10, 7  ;;  %vm449_vm2 = vcmask 32768  }
  0x4c   :  { %2744 = vmatmul.mubr.msk.f32.vlgmr.msra.gmra.mrb[0].mxu0 %vm101_vm1, %v74_v3  ;;  %2748 = vmatprep.subr.msk.mxu0 %vm105_vm0, %v3274_v4  ;;  %v3288_v9 = vld [vmem:[#allocation6 + $0x10] sm:$0x1f]  ;;  %v79_v13 = vld [vmem:[#allocation8] sm:$0xf]  ;;  %vm639_vm3 = vcmask 33793   ;;  %vm830_vm4 = vcmask 34818  }
  0x4d   :  { %2749 = vmatpush1.msk.msra.mxu0 %vm105_vm0, %v3276_v5  ;;  %343 = vmatprep.mubr.f32.mxu0 %v3178_v0  ;;  %v83_v12 = vsub.s32 0, %v3313_v11  ;;  %v87_v14 = vsub.s32 1, %v3313_v11  ;;  %v95_v18 = vsub.s32 3, %v3313_v11  ;;  %v91_v28 = vsub.s32 2, %v3313_v11 }
  0x4e   :  { %2746 = vmatpush1.msk.msra.mxu1 %vm105_vm0, %v77_v7  ;;  %2755 = vmatprep.subr.msk.mxu0 %vm105_vm0, %v3274_v4  ;;  %vm1021_vm5 = vcmask 35843   ;;  %vm1212_vm6 = vcmask 36868   ;;  %vm1403_vm7 = vcmask 37893  }
  0x4f   :  { %2747 = vmatmul.mubr.msk.f32.vlgmr.msra.gmra.mrb[0].mxu1 %vm101_vm1, %v74_v3  ;;  %2750 = vmatprep.subr.msk.mxu1 %vm105_vm0, %v3283_v8  ;;  %v84_v15 = vrot.slane %v79_v13, %v83_v12  ;;  %v88_v17 = vrot.slane %v79_v13, %v87_v14  ;;  %v96_v24 = vrot.slane %v79_v13, %v95_v18 }
  0x50   :  { %344 = vmatmul.mubr.f32.vlgmr.msra.gmra.mrb[2].mxu0 %v3178_v0  ;;  %2751 = vmatpush1.msk.msra.mxu1 %vm105_vm0, %v3288_v9  ;;  %v92_v35 = vrot.slane %v79_v13, %v91_v28 }
  0x51   :  { %414 = vmatprep.mubr.f32.mxu1 %v3178_v0  ;;  %2756 = vmatpush1.msk.msra.mxu0 %vm105_vm0, %v3276_v5 }
  0x52   :  { %2758 = vmatprep.subr.msk.mxu1 %vm105_vm0, %v3283_v8  ;;  %518 = vmatprep.mubr.f32.mxu0 %v3178_v0 }
  0x53   :  { %415 = vmatmul.mubr.f32.vlgmr.msra.gmra.mrb[2].mxu1 %v3178_v0  ;;  %2764 = vmatprep.subr.msk.mxu0 %vm105_vm0, %v3274_v4 }
  0x54   :  { %2759 = vmatpush1.msk.msra.mxu1 %vm105_vm0, %v3288_v9  ;;  %589 = vmatprep.mubr.f32.mxu1 %v3178_v0 }
  0x55   :  { %2767 = vmatprep.subr.msk.mxu1 %vm105_vm0, %v3283_v8 }
 0x11f   :  { %v184_v16 = vpop.f32.mrb[0].mxu0 }
 0x120   :  { %v186_v19 = vpop.f32.mrb[1].mxu0  ;;  %v3322_v20 = vadd.f32 %v184_v16, %v84_v15 }
 0x121   :  { %v3324_v22 = vadd.f32 %v186_v19, %v88_v17 }
 0x122   :  { %v255_v21 = vpop.f32.mrb[0].mxu1 }
 0x123   :  { %v345_v23 = vpop.f32.mrb[2].mxu0  ;;  %v257_v25 = vpop.f32.mrb[1].mxu1  ;;  %v3336_v37 = vadd.f32 %v255_v21, %v92_v35 }
 0x124   :  { %v421_v26 = vadd.f32 %v345_v23, %v3322_v20  ;;  %v347_v27 = vpop.f32.mrb[3].mxu0  ;;  %v3331_v33 = vadd.f32 %v257_v25, %v96_v24 }
 0x125   :  { %v422_v29 = vadd.f32 %v347_v27, %v3324_v22 }
 0x126   :  { %v2752_v30 = vmul.f32 -1.442695, %v421_v26  ;;  %v416_v31 = vpop.f32.mrb[2].mxu1 }
 0x127   :  { %v2753_v32 = vmul.f32 -1.442695, %v422_v29  ;;  %v418_v34 = vpop.f32.mrb[3].mxu1  ;;  %v423_v39 = vadd.f32 %v416_v31, %v3336_v37 }
 0x128   :  { %2864 = vpow2.f32 %v2752_v30  ;;  %v424_v36 = vadd.f32 %v418_v34, %v3331_v33 }
 0x129   :  { %2866 = vpow2.f32 %v2753_v32 }
 0x12a   :  { %v2754_v38 = vmul.f32 -1.442695, %v424_v36 }
 0x12c   :  { %2868 = vpow2.f32 %v2754_v38 }
 0x12d   :  { %2870 = vtanh.f32 %v423_v39 }
 0x132   :  { %v2865_v40 = vpop.eup %2864 }
 0x133   :  { %v2867_v41 = vpop.eup %2866  ;;  %v428_v42 = vadd.f32 1.0, %v2865_v40 }
 0x134   :  { %v434_v43 = vadd.f32 1.0, %v2867_v41 }
 0x135   :  { %2872 = vrcp.f32 %v428_v42 }
 0x136   :  { %2874 = vrcp.f32 %v434_v43  ;;  %v2869_v44 = vpop.eup %2868 }
 0x137   :  { %v2871_v45 = vpop.eup %2870  ;;  %v441_v49 = vadd.f32 1.0, %v2869_v44 }
 0x139   :  { %2876 = vrcp.f32 %v441_v49 }
 0x13f   :  { %v2873_v46 = vpop.eup %2872 }
 0x140   :  { %v2875_v47 = vpop.eup %2874  ;;  %v445_v48 = vmul.f32 %v2873_v46, %v2871_v45 }
 0x141   :  { %v444_v50 = vmul.f32 0.0, %v2875_v47 }
 0x143   :  { %v446_v51 = vadd.f32 %v445_v48, %v444_v50  ;;  %v2877_v52 = vpop.eup %2876 }
 0x145   :  { %2878 = vtanh.f32 %v446_v51  ;;  %v632_v24 = vrot.slane %v446_v51, 7 }
 0x14f   :  { %v2879_v53 = vpop.eup %2878 }
 0x150   :  { %v448_v54 = vmul.f32 %v2879_v53, %v2877_v52 }
 0x152   :  { %450 = vst.msk [vmem:[#allocation2] sm:$0x1] %vm449_vm2, %v448_v54  ;;  %2757 = vmatmul.mubr.msk.f32.vlgmr.msra.gmra.mrb[4].mxu0 %vm101_vm1, %v448_v54  ;;  %2760 = vmatmul.mubr.msk.f32.vlgmr.msra.gmra.mrb[4].mxu1 %vm101_vm1, %v448_v54 }
 0x153   :  { %2765 = vmatpush1.msk.msra.mxu0 %vm105_vm0, %v3276_v5  ;;  %709 = vmatprep.mubr.f32.mxu0 %v3178_v0 }
 0x154   :  { %2768 = vmatpush1.msk.msra.mxu1 %vm105_vm0, %v3288_v9  ;;  %780 = vmatprep.mubr.f32.mxu1 %v3178_v0 }
 0x155   :  { %2773 = vmatprep.subr.msk.mxu0 %vm105_vm0, %v3274_v4  ;;  %2776 = vmatprep.subr.msk.mxu1 %vm105_vm0, %v3283_v8 }
 0x225   :  { %v520_v55 = vpop.f32.mrb[4].mxu0  ;;  %v591_v56 = vpop.f32.mrb[4].mxu1 }
 0x226   :  { %v600_v57 = vrot.slane %v520_v55, 7  ;;  %v522_v58 = vpop.f32.mrb[5].mxu0  ;;  %v593_v59 = vpop.f32.mrb[5].mxu1  ;;  %v602_v6 = vrot.slane %v591_v56, 7 }
 0x227   :  { %v601_v60 = vrot.slane %v522_v58, 7  ;;  %v603_v2 = vrot.slane %v593_v59, 7 }
 0x228   :  { %v608_v61 = vadd.f32 %v600_v57, %v3322_v20  ;;  %v610_v10 = vadd.f32 %v602_v6, %v3336_v37 }
 0x229   :  { %v609_v62 = vadd.f32 %v601_v60, %v3324_v22  ;;  %v611_v3 = vadd.f32 %v603_v2, %v3331_v33 }
 0x22a   :  { %v2761_v63 = vmul.f32 -1.442695, %v608_v61 }
 0x22b   :  { %v2762_v1 = vmul.f32 -1.442695, %v609_v62  ;;  %v2763_v7 = vmul.f32 -1.442695, %v611_v3 }
 0x22c   :  { %2880 = vpow2.f32 %v2761_v63 }
 0x22d   :  { %2882 = vpow2.f32 %v2762_v1 }
 0x22e   :  { %2884 = vpow2.f32 %v2763_v7 }
 0x22f   :  { %2886 = vtanh.f32 %v610_v10 }
 0x236   :  { %v2881_v13 = vpop.eup %2880 }
 0x237   :  { %v2883_v15 = vpop.eup %2882  ;;  %v615_v16 = vadd.f32 1.0, %v2881_v13 }
 0x238   :  { %v621_v17 = vadd.f32 1.0, %v2883_v15  ;;  %v2885_v19 = vpop.eup %2884 }
 0x239   :  { %2888 = vrcp.f32 %v615_v16  ;;  %v2887_v21 = vpop.eup %2886  ;;  %v628_v27 = vadd.f32 1.0, %v2885_v19 }
 0x23a   :  { %2890 = vrcp.f32 %v621_v17 }
 0x23b   :  { %2892 = vrcp.f32 %v628_v27 }
 0x243   :  { %v2889_v23 = vpop.eup %2888 }
 0x244   :  { %v2891_v25 = vpop.eup %2890  ;;  %v635_v26 = vmul.f32 %v2889_v23, %v2887_v21 }
 0x245   :  { %v634_v29 = vmul.f32 %v2891_v25, %v632_v24  ;;  %v2893_v31 = vpop.eup %2892 }
 0x247   :  { %v636_v30 = vadd.f32 %v635_v26, %v634_v29 }
 0x249   :  { %2894 = vtanh.f32 %v636_v30  ;;  %v823_v59 = vrot.slane %v636_v30, 7 }
 0x253   :  { %v2895_v32 = vpop.eup %2894 }
 0x254   :  { %v638_v34 = vmul.f32 %v2895_v32, %v2893_v31 }
 0x256   :  { %640 = vst.msk [vmem:[#allocation2] sm:$0x2] %vm639_vm3, %v638_v34  ;;  %v642_v35 = vrot.slane %v638_v34, 1 }
 0x258   :  { %2766 = vmatmul.mubr.msk.f32.vlgmr.msra.gmra.mrb[6].mxu0 %vm101_vm1, %v642_v35  ;;  %2769 = vmatmul.mubr.msk.f32.vlgmr.msra.gmra.mrb[6].mxu1 %vm101_vm1, %v642_v35 }
 0x259   :  { %2774 = vmatpush1.msk.msra.mxu0 %vm105_vm0, %v3276_v5  ;;  %900 = vmatprep.mubr.f32.mxu0 %v3178_v0 }
 0x25a   :  { %2777 = vmatpush1.msk.msra.mxu1 %vm105_vm0, %v3288_v9  ;;  %971 = vmatprep.mubr.f32.mxu1 %v3178_v0 }
 0x25b   :  { %2782 = vmatprep.subr.msk.mxu0 %vm105_vm0, %v3274_v4  ;;  %2785 = vmatprep.subr.msk.mxu1 %vm105_vm0, %v3283_v8 }
 0x32b   :  { %v711_v36 = vpop.f32.mrb[6].mxu0  ;;  %v782_v38 = vpop.f32.mrb[6].mxu1 }
 0x32c   :  { %v791_v39 = vrot.slane %v711_v36, 6  ;;  %v713_v40 = vpop.f32.mrb[7].mxu0  ;;  %v784_v41 = vpop.f32.mrb[7].mxu1  ;;  %v793_v49 = vrot.slane %v782_v38, 6 }
 0x32d   :  { %v792_v42 = vrot.slane %v713_v40, 6  ;;  %v794_v47 = vrot.slane %v784_v41, 6 }
 0x32e   :  { %v799_v43 = vadd.f32 %v791_v39, %v3322_v20  ;;  %v801_v51 = vadd.f32 %v793_v49, %v3336_v37 }
 0x32f   :  { %v800_v44 = vadd.f32 %v792_v42, %v3324_v22  ;;  %v802_v48 = vadd.f32 %v794_v47, %v3331_v33 }
 0x330   :  { %v2770_v45 = vmul.f32 -1.442695, %v799_v43 }
 0x331   :  { %v2771_v46 = vmul.f32 -1.442695, %v800_v44  ;;  %v2772_v50 = vmul.f32 -1.442695, %v802_v48 }
 0x332   :  { %2896 = vpow2.f32 %v2770_v45 }
 0x333   :  { %2898 = vpow2.f32 %v2771_v46 }
 0x334   :  { %2900 = vpow2.f32 %v2772_v50 }
 0x335   :  { %2902 = vtanh.f32 %v801_v51 }
 0x33c   :  { %v2897_v52 = vpop.eup %2896 }
 0x33d   :  { %v2899_v53 = vpop.eup %2898  ;;  %v806_v54 = vadd.f32 1.0, %v2897_v52 }
 0x33e   :  { %v812_v55 = vadd.f32 1.0, %v2899_v53  ;;  %v2901_v56 = vpop.eup %2900 }
 0x33f   :  { %2904 = vrcp.f32 %v806_v54  ;;  %v2903_v57 = vpop.eup %2902  ;;  %v819_v62 = vadd.f32 1.0, %v2901_v56 }
 0x340   :  { %2906 = vrcp.f32 %v812_v55 }
 0x341   :  { %2908 = vrcp.f32 %v819_v62 }
 0x349   :  { %v2905_v58 = vpop.eup %2904 }
 0x34a   :  { %v2907_v60 = vpop.eup %2906  ;;  %v826_v61 = vmul.f32 %v2905_v58, %v2903_v57 }
 0x34b   :  { %v825_v63 = vmul.f32 %v2907_v60, %v823_v59  ;;  %v2909_v2 = vpop.eup %2908 }
 0x34d   :  { %v827_v1 = vadd.f32 %v826_v61, %v825_v63 }
 0x34f   :  { %2910 = vtanh.f32 %v827_v1  ;;  %v1014_v39 = vrot.slane %v827_v1, 7 }
 0x359   :  { %v2911_v3 = vpop.eup %2910 }
 0x35a   :  { %v829_v6 = vmul.f32 %v2911_v3, %v2909_v2 }
 0x35c   :  { %831 = vst.msk [vmem:[#allocation2] sm:$0x4] %vm830_vm4, %v829_v6  ;;  %v833_v7 = vrot.slane %v829_v6, 2 }
 0x35e   :  { %2775 = vmatmul.mubr.msk.f32.vlgmr.msra.gmra.mrb[8].mxu0 %vm101_vm1, %v833_v7  ;;  %2778 = vmatmul.mubr.msk.f32.vlgmr.msra.gmra.mrb[8].mxu1 %vm101_vm1, %v833_v7 }
 0x35f   :  { %2783 = vmatpush1.msk.msra.mxu0 %vm105_vm0, %v3276_v5  ;;  %1091 = vmatprep.mubr.f32.mxu0 %v3178_v0 }
 0x360   :  { %2786 = vmatpush1.msk.msra.mxu1 %vm105_vm0, %v3288_v9  ;;  %1162 = vmatprep.mubr.f32.mxu1 %v3178_v0 }
 0x361   :  { %2791 = vmatprep.subr.msk.mxu0 %vm105_vm0, %v3274_v4  ;;  %2794 = vmatprep.subr.msk.mxu1 %vm105_vm0, %v3283_v8 }
 0x431   :  { %v902_v10 = vpop.f32.mrb[8].mxu0  ;;  %v973_v13 = vpop.f32.mrb[8].mxu1 }
 0x432   :  { %v982_v15 = vrot.slane %v902_v10, 5  ;;  %v904_v16 = vpop.f32.mrb[9].mxu0  ;;  %v975_v17 = vpop.f32.mrb[9].mxu1  ;;  %v984_v27 = vrot.slane %v973_v13, 5 }
 0x433   :  { %v983_v19 = vrot.slane %v904_v16, 5  ;;  %v985_v26 = vrot.slane %v975_v17, 5 }
 0x434   :  { %v990_v21 = vadd.f32 %v982_v15, %v3322_v20  ;;  %v992_v8 = vadd.f32 %v984_v27, %v3336_v37  ;;  %v1409_v27 = vld [vmem:[#allocation9 + $0x18] sm:$0x1f] }
 0x435   :  { %v991_v23 = vadd.f32 %v983_v19, %v3324_v22  ;;  %v993_v4 = vadd.f32 %v985_v26, %v3331_v33  ;;  %v1407_v26 = vld [vmem:[#allocation9 + $0x8] sm:$0x1f] }
 0x436   :  { %v2779_v24 = vmul.f32 -1.442695, %v990_v21 }
 0x437   :  { %v2780_v25 = vmul.f32 -1.442695, %v991_v23  ;;  %v2781_v29 = vmul.f32 -1.442695, %v993_v4  ;;  %v1406_v4 = vld [vmem:[#allocation9] sm:$0x1f] }
 0x438   :  { %2912 = vpow2.f32 %v2779_v24 }
 0x439   :  { %2914 = vpow2.f32 %v2780_v25 }
 0x43a   :  { %2916 = vpow2.f32 %v2781_v29  ;;  %v1408_v29 = vld [vmem:[#allocation9 + $0x10] sm:$0x1f] }
 0x43b   :  { %2918 = vtanh.f32 %v992_v8  ;;  %v3415_v8 = vld [vmem:[%s3577_s5 + $0x8] sm:$0x1f] }
 0x442   :  { %v2913_v30 = vpop.eup %2912 }
 0x443   :  { %v2915_v31 = vpop.eup %2914  ;;  %v997_v32 = vadd.f32 1.0, %v2913_v30  ;;  %v3422_v30 = vld [vmem:[%s3577_s5 + $0x18] sm:$0x1f] }
 0x444   :  { %v1003_v34 = vadd.f32 1.0, %v2915_v31  ;;  %v2917_v35 = vpop.eup %2916 }
 0x445   :  { %2920 = vrcp.f32 %v997_v32  ;;  %v2919_v36 = vpop.eup %2918  ;;  %v1010_v42 = vadd.f32 1.0, %v2917_v35 }
 0x446   :  { %2922 = vrcp.f32 %v1003_v34 }
 0x447   :  { %2924 = vrcp.f32 %v1010_v42 }
 0x44f   :  { %v2921_v38 = vpop.eup %2920 }
 0x450   :  { %v2923_v40 = vpop.eup %2922  ;;  %v1017_v41 = vmul.f32 %v2921_v38, %v2919_v36 }
 0x451   :  { %v1016_v43 = vmul.f32 %v2923_v40, %v1014_v39  ;;  %v2925_v45 = vpop.eup %2924 }
 0x453   :  { %v1018_v44 = vadd.f32 %v1017_v41, %v1016_v43 }
 0x455   :  { %2926 = vtanh.f32 %v1018_v44  ;;  %v1205_v10 = vrot.slane %v1018_v44, 7 }
 0x45f   :  { %v2927_v46 = vpop.eup %2926 }
 0x460   :  { %v1020_v47 = vmul.f32 %v2927_v46, %v2925_v45 }
 0x462   :  { %1022 = vst.msk [vmem:[#allocation2] sm:$0x8] %vm1021_vm5, %v1020_v47  ;;  %v1024_v48 = vrot.slane %v1020_v47, 3 }
 0x464   :  { %2784 = vmatmul.mubr.msk.f32.vlgmr.msra.gmra.mrb[10].mxu0 %vm101_vm1, %v1024_v48  ;;  %2787 = vmatmul.mubr.msk.f32.vlgmr.msra.gmra.mrb[10].mxu1 %vm101_vm1, %v1024_v48 }
 0x465   :  { %2792 = vmatpush1.msk.msra.mxu0 %vm105_vm0, %v3276_v5  ;;  %1282 = vmatprep.mubr.f32.mxu0 %v3178_v0 }
 0x466   :  { %2795 = vmatpush1.msk.msra.mxu1 %vm105_vm0, %v3288_v9  ;;  %1353 = vmatprep.mubr.f32.mxu1 %v3178_v0 }
 0x467   :  { %2800 = vmatprep.subr.msk.mxu0 %vm105_vm0, %v1407_v26  ;;  %2803 = vmatprep.subr.msk.mxu1 %vm105_vm0, %v1409_v27 }
 0x537   :  { %v1093_v49 = vpop.f32.mrb[10].mxu0  ;;  %v1164_v50 = vpop.f32.mrb[10].mxu1 }
 0x538   :  { %v1173_v51 = vrot.slane %v1093_v49, 4  ;;  %v1095_v52 = vpop.f32.mrb[11].mxu0  ;;  %v1166_v53 = vpop.f32.mrb[11].mxu1  ;;  %v1175_v9 = vrot.slane %v1164_v50, 4 }
 0x539   :  { %v1174_v54 = vrot.slane %v1095_v52, 4  ;;  %v1176_v5 = vrot.slane %v1166_v53, 4 }
 0x53a   :  { %v1181_v55 = vadd.f32 %v1173_v51, %v3322_v20  ;;  %v1183_v61 = vadd.f32 %v1175_v9, %v3336_v37 }
 0x53b   :  { %v1182_v56 = vadd.f32 %v1174_v54, %v3324_v22  ;;  %v1184_v59 = vadd.f32 %v1176_v5, %v3331_v33 }
 0x53c   :  { %v2788_v57 = vmul.f32 -1.442695, %v1181_v55 }
 0x53d   :  { %v2789_v58 = vmul.f32 -1.442695, %v1182_v56  ;;  %v2790_v60 = vmul.f32 -1.442695, %v1184_v59  ;;  %v3434_v59 = vld [vmem:[%s3577_s5] sm:$0x1f] }
 0x53e   :  { %2928 = vpow2.f32 %v2788_v57 }
 0x53f   :  { %2930 = vpow2.f32 %v2789_v58 }
 0x540   :  { %2932 = vpow2.f32 %v2790_v60  ;;  %v3439_v60 = vld [vmem:[%s3577_s5 + $0x10] sm:$0x1f] }
 0x541   :  { %2934 = vtanh.f32 %v1183_v61  ;;  %v1410_v61 = vld [vmem:[%s3578_s6] sm:$0xf]  ;;  %s3179_s6 = smov [#allocation11]  }
 0x542   :  { %s2731_s9 = sshll.u32 %s3179_s6, 4  ;;  %s2732_s9 = int_to_ptr.vmem [resolvable:$true] %s2731_s9 }
 0x543   :  { %s3144_s10 = scalar_lea.vmem %s2732_s9, 128  ;;  %p3149_p5 = scmp.lt.s32.totalorder %s2732_s9, %s2732_s9 }
 0x544   :  { %p3145_p4 = scmp.ne.s32.totalorder %s2732_s9, %s3144_s10  ;;  %p3150_p6 = scmp.lt.s32.totalorder %s3144_s10, %s3144_s10 }
 0x546   :  { %p3151_p7 = por %p3150_p6, %p3149_p5 }
 0x548   :  { %v2929_v62 = vpop.eup %2928  ;;  %p3152_p8 = pnand %p3151_p7, %p3145_p4 }
 0x549   :  { %v2931_v63 = vpop.eup %2930  ;;  %v1188_v1 = vadd.f32 1.0, %v2929_v62  ;;  %v1415_v62 = vrot.slane %v1410_v61, %v83_v12  ;;  %v1427_v12 = vrot.slane %v1410_v61, %v95_v18 }
 0x54a   :  { %v1194_v2 = vadd.f32 1.0, %v2931_v63  ;;  %v2933_v3 = vpop.eup %2932 }
 0x54b   :  { %2936 = vrcp.f32 %v1188_v1  ;;  %v2935_v6 = vpop.eup %2934  ;;  %v1201_v16 = vadd.f32 1.0, %v2933_v3 }
 0x54c   :  { %2938 = vrcp.f32 %v1194_v2  ;;  %v1419_v2 = vrot.slane %v1410_v61, %v87_v14 }
 0x54d   :  { %2940 = vrcp.f32 %v1201_v16 }
 0x555   :  { %v2937_v7 = vpop.eup %2936 }
 0x556   :  { %v2939_v13 = vpop.eup %2938  ;;  %v1208_v15 = vmul.f32 %v2937_v7, %v2935_v6 }
 0x557   :  { %v1207_v17 = vmul.f32 %v2939_v13, %v1205_v10  ;;  %v2941_v21 = vpop.eup %2940 }
 0x559   :  { %v1209_v19 = vadd.f32 %v1208_v15, %v1207_v17 }
 0x55b   :  { %2942 = vtanh.f32 %v1209_v19  ;;  %v1396_v53 = vrot.slane %v1209_v19, 7 }
 0x565   :  { %v2943_v23 = vpop.eup %2942 }
 0x566   :  { %v1211_v24 = vmul.f32 %v2943_v23, %v2941_v21 }
 0x568   :  { %1213 = vst.msk [vmem:[#allocation2] sm:$0x10] %vm1212_vm6, %v1211_v24  ;;  %v1215_v25 = vrot.slane %v1211_v24, 4 }
 0x56a   :  { %2793 = vmatmul.mubr.msk.f32.vlgmr.msra.gmra.mrb[12].mxu0 %vm101_vm1, %v1215_v25  ;;  %2796 = vmatmul.mubr.msk.f32.vlgmr.msra.gmra.mrb[12].mxu1 %vm101_vm1, %v1215_v25  ;;  %v1423_v25 = vrot.slane %v1410_v61, %v91_v28 }
 0x56b   :  { %1511 = vmatprep.mubr.f32.mxu0 %v3178_v0  ;;  %1582 = vmatprep.mubr.f32.mxu1 %v3178_v0 }
 0x56c   :  { %2801 = vmatpush1.msk.msra.mxu0 %vm105_vm0, %v1406_v4  ;;  %2804 = vmatpush1.msk.msra.mxu1 %vm105_vm0, %v1408_v29 }
 0x56d   :  { %2806 = vmatprep.subr.msk.mxu0 %vm105_vm0, %v3415_v8  ;;  %2808 = vmatprep.subr.msk.mxu1 %vm105_vm0, %v3422_v30 }
 0x63d   :  { %v1284_v31 = vpop.f32.mrb[12].mxu0  ;;  %v1355_v32 = vpop.f32.mrb[12].mxu1 }
 0x63e   :  { %v1364_v34 = vrot.slane %v1284_v31, 3  ;;  %v1286_v35 = vpop.f32.mrb[13].mxu0  ;;  %v1357_v36 = vpop.f32.mrb[13].mxu1  ;;  %v1366_v45 = vrot.slane %v1355_v32, 3 }
 0x63f   :  { %v1365_v38 = vrot.slane %v1286_v35, 3  ;;  %v1367_v43 = vrot.slane %v1357_v36, 3 }
 0x640   :  { %v1372_v39 = vadd.f32 %v1364_v34, %v3322_v20  ;;  %v1374_v47 = vadd.f32 %v1366_v45, %v3336_v37 }
 0x641   :  { %v1373_v40 = vadd.f32 %v1365_v38, %v3324_v22  ;;  %v1375_v44 = vadd.f32 %v1367_v43, %v3331_v33 }
 0x642   :  { %v2797_v41 = vmul.f32 -1.442695, %v1372_v39 }
 0x643   :  { %v2798_v42 = vmul.f32 -1.442695, %v1373_v40  ;;  %v2799_v46 = vmul.f32 -1.442695, %v1375_v44 }
 0x644   :  { %2944 = vpow2.f32 %v2797_v41 }
 0x645   :  { %2946 = vpow2.f32 %v2798_v42 }
 0x646   :  { %2948 = vpow2.f32 %v2799_v46 }
 0x647   :  { %2950 = vtanh.f32 %v1374_v47 }
 0x64e   :  { %v2945_v48 = vpop.eup %2944 }
 0x64f   :  { %v2947_v49 = vpop.eup %2946  ;;  %v1379_v50 = vadd.f32 1.0, %v2945_v48 }
 0x650   :  { %v1385_v51 = vadd.f32 1.0, %v2947_v49  ;;  %v2949_v20 = vpop.eup %2948 }
 0x651   :  { %2952 = vrcp.f32 %v1379_v50  ;;  %v2951_v22 = vpop.eup %2950  ;;  %v1392_v56 = vadd.f32 1.0, %v2949_v20 }
 0x652   :  { %2954 = vrcp.f32 %v1385_v51 }
 0x653   :  { %2956 = vrcp.f32 %v1392_v56 }
 0x65b   :  { %v2953_v52 = vpop.eup %2952 }
 0x65c   :  { %v2955_v54 = vpop.eup %2954  ;;  %v1399_v55 = vmul.f32 %v2953_v52, %v2951_v22 }
 0x65d   :  { %v1398_v33 = vmul.f32 %v2955_v54, %v1396_v53  ;;  %v2957_v37 = vpop.eup %2956 }
 0x65f   :  { %v1400_v57 = vadd.f32 %v1399_v55, %v1398_v33 }
 0x661   :  { %2958 = vtanh.f32 %v1400_v57 }
 0x66b   :  { %v2959_v58 = vpop.eup %2958 }
 0x66c   :  { %v1402_v5 = vmul.f32 %v2959_v58, %v2957_v37 }
 0x66e   :  { %1404 = vst.msk [vmem:[#allocation2] sm:$0x20] %vm1403_vm7, %v1402_v5 }
 0x675   :  { %v1405_v9 = vld [vmem:[#allocation2] sm:$0x3f] }
 0x676   :  { %2802 = vmatmul.mubr.msk.f32.vlgmr.msra.gmra.mrb[14].mxu0 %vm101_vm1, %v1405_v9  ;;  %2805 = vmatmul.mubr.msk.f32.vlgmr.msra.gmra.mrb[14].mxu1 %vm101_vm1, %v1405_v9 }
 0x677   :  { %2807 = vmatpush1.msk.msra.mxu0 %vm105_vm0, %v3434_v59  ;;  %1669 = vmatprep.mubr.f32.mxu0 %v3178_v0 }
 0x678   :  { %2809 = vmatpush1.msk.msra.mxu1 %vm105_vm0, %v3439_v60  ;;  %1740 = vmatprep.mubr.f32.mxu1 %v3178_v0 }
 0x679   :  { %2813 = vmatprep.subr.msk.mxu0 %vm105_vm0, %v3415_v8  ;;  %2816 = vmatprep.subr.msk.mxu1 %vm105_vm0, %v3422_v30 }
 0x67a   :  { %1670 = vmatmul.mubr.f32.vlgmr.msra.gmra.mrb[16].mxu0 %v3178_v0  ;;  %1741 = vmatmul.mubr.f32.vlgmr.msra.gmra.mrb[16].mxu1 %v3178_v0 }
 0x67b   :  { %2814 = vmatpush1.msk.msra.mxu0 %vm105_vm0, %v3434_v59  ;;  %1843 = vmatprep.mubr.f32.mxu0 %v3178_v0 }
 0x67c   :  { %2817 = vmatpush1.msk.msra.mxu1 %vm105_vm0, %v3439_v60  ;;  %1914 = vmatprep.mubr.f32.mxu1 %v3178_v0 }
 0x67d   :  { %2822 = vmatprep.subr.msk.mxu0 %vm105_vm0, %v3415_v8  ;;  %2825 = vmatprep.subr.msk.mxu1 %vm105_vm0, %v3422_v30 }
 0x749   :  { %v1513_v63 = vpop.f32.mrb[14].mxu0  ;;  %v1584_v1 = vpop.f32.mrb[14].mxu1 }
 0x74a   :  { %v1515_v3 = vpop.f32.mrb[15].mxu0  ;;  %v1586_v6 = vpop.f32.mrb[15].mxu1  ;;  %v3472_v7 = vadd.f32 %v1513_v63, %v1415_v62  ;;  %v3485_v4 = vadd.f32 %v1584_v1, %v1423_v25 }
 0x74b   :  { %v3474_v10 = vadd.f32 %v1515_v3, %v1419_v2  ;;  %v3480_v14 = vadd.f32 %v1586_v6, %v1427_v12 }
 0x74d   :  { %v1671_v13 = vpop.f32.mrb[16].mxu0  ;;  %v1742_v15 = vpop.f32.mrb[16].mxu1 }
 0x74e   :  { %v1747_v16 = vadd.f32 %v1671_v13, %v3472_v7  ;;  %v1673_v17 = vpop.f32.mrb[17].mxu0  ;;  %v1744_v19 = vpop.f32.mrb[17].mxu1  ;;  %v1749_v29 = vadd.f32 %v1742_v15, %v3485_v4 }
 0x74f   :  { %v1748_v21 = vadd.f32 %v1673_v17, %v3474_v10  ;;  %v1750_v26 = vadd.f32 %v1744_v19, %v3480_v14 }
 0x750   :  { %v2810_v23 = vmul.f32 -1.442695, %v1747_v16 }
 0x751   :  { %v2811_v24 = vmul.f32 -1.442695, %v1748_v21  ;;  %v2812_v27 = vmul.f32 -1.442695, %v1750_v26 }
 0x752   :  { %2960 = vpow2.f32 %v2810_v23 }
 0x753   :  { %2962 = vpow2.f32 %v2811_v24 }
 0x754   :  { %2964 = vpow2.f32 %v2812_v27 }
 0x755   :  { %2966 = vtanh.f32 %v1749_v29 }
 0x75c   :  { %v2961_v31 = vpop.eup %2960 }
 0x75d   :  { %v2963_v18 = vpop.eup %2962  ;;  %v1754_v32 = vadd.f32 1.0, %v2961_v31 }
 0x75e   :  { %v1760_v34 = vadd.f32 1.0, %v2963_v18  ;;  %v2965_v35 = vpop.eup %2964 }
 0x75f   :  { %2968 = vrcp.f32 %v1754_v32  ;;  %v2967_v36 = vpop.eup %2966  ;;  %v1767_v39 = vadd.f32 1.0, %v2965_v35 }
 0x760   :  { %2970 = vrcp.f32 %v1760_v34 }
 0x761   :  { %2972 = vrcp.f32 %v1767_v39 }
 0x769   :  { %v2969_v38 = vpop.eup %2968 }
 0x76a   :  { %v2971_v11 = vpop.eup %2970  ;;  %v1771_v28 = vmul.f32 %v2969_v38, %v2967_v36 }
 0x76b   :  { %v1770_v40 = vmul.f32 0.0, %v2971_v11  ;;  %v2973_v42 = vpop.eup %2972 }
 0x76d   :  { %v1772_v41 = vadd.f32 %v1771_v28, %v1770_v40 }
 0x76f   :  { %2974 = vtanh.f32 %v1772_v41  ;;  %v1957_v63 = vrot.slane %v1772_v41, 7 }
 0x779   :  { %v2975_v43 = vpop.eup %2974 }
 0x77a   :  { %v1774_v44 = vmul.f32 %v2975_v43, %v2973_v42 }
 0x77c   :  { %2815 = vmatmul.mubr.msk.f32.vlgmr.msra.gmra.mrb[18].mxu0 %vm101_vm1, %v1774_v44  ;;  %1775 = vst.msk [vmem:[#allocation11] sm:$0x1] %vm449_vm2, %v1774_v44  ;;  %2818 = vmatmul.mubr.msk.f32.vlgmr.msra.gmra.mrb[18].mxu1 %vm101_vm1, %v1774_v44 }
 0x77d   :  { %2823 = vmatpush1.msk.msra.mxu0 %vm105_vm0, %v3434_v59  ;;  %2033 = vmatprep.mubr.f32.mxu0 %v3178_v0 }
 0x77e   :  { %2826 = vmatpush1.msk.msra.mxu1 %vm105_vm0, %v3439_v60  ;;  %2104 = vmatprep.mubr.f32.mxu1 %v3178_v0 }
 0x77f   :  { %2831 = vmatprep.subr.msk.mxu0 %vm105_vm0, %v3415_v8  ;;  %2834 = vmatprep.subr.msk.mxu1 %vm105_vm0, %v3422_v30 }
 0x84f   :  { %v1845_v45 = vpop.f32.mrb[18].mxu0  ;;  %v1916_v46 = vpop.f32.mrb[18].mxu1 }
 0x850   :  { %v1925_v47 = vrot.slane %v1845_v45, 7  ;;  %v1847_v48 = vpop.f32.mrb[19].mxu0  ;;  %v1918_v49 = vpop.f32.mrb[19].mxu1  ;;  %v1927_v55 = vrot.slane %v1916_v46, 7 }
 0x851   :  { %v1926_v50 = vrot.slane %v1847_v48, 7  ;;  %v1928_v53 = vrot.slane %v1918_v49, 7 }
 0x852   :  { %v1933_v51 = vadd.f32 %v1925_v47, %v3472_v7  ;;  %v1935_v33 = vadd.f32 %v1927_v55, %v3485_v4 }
 0x853   :  { %v1934_v20 = vadd.f32 %v1926_v50, %v3474_v10  ;;  %v1936_v54 = vadd.f32 %v1928_v53, %v3480_v14 }
 0x854   :  { %v2819_v22 = vmul.f32 -1.442695, %v1933_v51 }
 0x855   :  { %v2820_v52 = vmul.f32 -1.442695, %v1934_v20  ;;  %v2821_v56 = vmul.f32 -1.442695, %v1936_v54 }
 0x856   :  { %2976 = vpow2.f32 %v2819_v22 }
 0x857   :  { %2978 = vpow2.f32 %v2820_v52 }
 0x858   :  { %2980 = vpow2.f32 %v2821_v56 }
 0x859   :  { %2982 = vtanh.f32 %v1935_v33 }
 0x860   :  { %v2977_v57 = vpop.eup %2976 }
 0x861   :  { %v2979_v37 = vpop.eup %2978  ;;  %v1940_v58 = vadd.f32 1.0, %v2977_v57 }
 0x862   :  { %v1946_v5 = vadd.f32 1.0, %v2979_v37  ;;  %v2981_v9 = vpop.eup %2980 }
 0x863   :  { %2984 = vrcp.f32 %v1940_v58  ;;  %v2983_v61 = vpop.eup %2982  ;;  %v1953_v3 = vadd.f32 1.0, %v2981_v9 }
 0x864   :  { %2986 = vrcp.f32 %v1946_v5 }
 0x865   :  { %2988 = vrcp.f32 %v1953_v3 }
 0x86d   :  { %v2985_v62 = vpop.eup %2984 }
 0x86e   :  { %v2987_v1 = vpop.eup %2986  ;;  %v1960_v2 = vmul.f32 %v2985_v62, %v2983_v61 }
 0x86f   :  { %v1959_v6 = vmul.f32 %v2987_v1, %v1957_v63  ;;  %v2989_v15 = vpop.eup %2988 }
 0x871   :  { %v1961_v13 = vadd.f32 %v1960_v2, %v1959_v6 }
 0x873   :  { %2990 = vtanh.f32 %v1961_v13  ;;  %v2147_v44 = vrot.slane %v1961_v13, 7 }
 0x87d   :  { %v2991_v16 = vpop.eup %2990 }
 0x87e   :  { %v1963_v17 = vmul.f32 %v2991_v16, %v2989_v15 }
 0x880   :  { %v1966_v19 = vrot.slane %v1963_v17, 1  ;;  %1964 = vst.msk [vmem:[#allocation11] sm:$0x2] %vm639_vm3, %v1963_v17 }
 0x882   :  { %2824 = vmatmul.mubr.msk.f32.vlgmr.msra.gmra.mrb[20].mxu0 %vm101_vm1, %v1966_v19  ;;  %2827 = vmatmul.mubr.msk.f32.vlgmr.msra.gmra.mrb[20].mxu1 %vm101_vm1, %v1966_v19 }
 0x883   :  { %2832 = vmatpush1.msk.msra.mxu0 %vm105_vm0, %v3434_v59  ;;  %2223 = vmatprep.mubr.f32.mxu0 %v3178_v0 }
 0x884   :  { %2835 = vmatpush1.msk.msra.mxu1 %vm105_vm0, %v3439_v60  ;;  %2294 = vmatprep.mubr.f32.mxu1 %v3178_v0 }
 0x885   :  { %2840 = vmatprep.subr.msk.mxu0 %vm105_vm0, %v3415_v8  ;;  %2843 = vmatprep.subr.msk.mxu1 %vm105_vm0, %v3422_v30 }
 0x955   :  { %v2035_v12 = vpop.f32.mrb[20].mxu0  ;;  %v2106_v21 = vpop.f32.mrb[20].mxu1 }
 0x956   :  { %v2115_v23 = vrot.slane %v2035_v12, 6  ;;  %v2037_v24 = vpop.f32.mrb[21].mxu0  ;;  %v2108_v25 = vpop.f32.mrb[21].mxu1  ;;  %v2117_v35 = vrot.slane %v2106_v21, 6 }
 0x957   :  { %v2116_v26 = vrot.slane %v2037_v24, 6  ;;  %v2118_v32 = vrot.slane %v2108_v25, 6 }
 0x958   :  { %v2123_v27 = vadd.f32 %v2115_v23, %v3472_v7  ;;  %v2125_v38 = vadd.f32 %v2117_v35, %v3485_v4 }
 0x959   :  { %v2124_v29 = vadd.f32 %v2116_v26, %v3474_v10  ;;  %v2126_v34 = vadd.f32 %v2118_v32, %v3480_v14 }
 0x95a   :  { %v2828_v31 = vmul.f32 -1.442695, %v2123_v27 }
 0x95b   :  { %v2829_v18 = vmul.f32 -1.442695, %v2124_v29  ;;  %v2830_v36 = vmul.f32 -1.442695, %v2126_v34 }
 0x95c   :  { %2992 = vpow2.f32 %v2828_v31 }
 0x95d   :  { %2994 = vpow2.f32 %v2829_v18 }
 0x95e   :  { %2996 = vpow2.f32 %v2830_v36 }
 0x95f   :  { %2998 = vtanh.f32 %v2125_v38 }
 0x966   :  { %v2993_v11 = vpop.eup %2992 }
 0x967   :  { %v2995_v28 = vpop.eup %2994  ;;  %v2130_v39 = vadd.f32 1.0, %v2993_v11 }
 0x968   :  { %v2136_v40 = vadd.f32 1.0, %v2995_v28  ;;  %v2997_v41 = vpop.eup %2996 }
 0x969   :  { %3000 = vrcp.f32 %v2130_v39  ;;  %v2999_v42 = vpop.eup %2998  ;;  %v2143_v47 = vadd.f32 1.0, %v2997_v41 }
 0x96a   :  { %3002 = vrcp.f32 %v2136_v40 }
 0x96b   :  { %3004 = vrcp.f32 %v2143_v47 }
 0x973   :  { %v3001_v43 = vpop.eup %3000 }
 0x974   :  { %v3003_v45 = vpop.eup %3002  ;;  %v2150_v46 = vmul.f32 %v3001_v43, %v2999_v42 }
 0x975   :  { %v2149_v48 = vmul.f32 %v3003_v45, %v2147_v44  ;;  %v3005_v50 = vpop.eup %3004 }
 0x977   :  { %v2151_v49 = vadd.f32 %v2150_v46, %v2149_v48 }
 0x979   :  { %3006 = vtanh.f32 %v2151_v49  ;;  %v2337_v16 = vrot.slane %v2151_v49, 7 }
 0x983   :  { %v3007_v51 = vpop.eup %3006 }
 0x984   :  { %v2153_v20 = vmul.f32 %v3007_v51, %v3005_v50 }
 0x986   :  { %v2156_v22 = vrot.slane %v2153_v20, 2  ;;  %2154 = vst.msk [vmem:[#allocation11] sm:$0x4] %vm830_vm4, %v2153_v20 }
 0x988   :  { %2833 = vmatmul.mubr.msk.f32.vlgmr.msra.gmra.mrb[22].mxu0 %vm101_vm1, %v2156_v22  ;;  %2836 = vmatmul.mubr.msk.f32.vlgmr.msra.gmra.mrb[22].mxu1 %vm101_vm1, %v2156_v22 }
 0x989   :  { %2841 = vmatpush1.msk.msra.mxu0 %vm105_vm0, %v3434_v59  ;;  %2413 = vmatprep.mubr.f32.mxu0 %v3178_v0 }
 0x98a   :  { %2844 = vmatpush1.msk.msra.mxu1 %vm105_vm0, %v3439_v60  ;;  %2484 = vmatprep.mubr.f32.mxu1 %v3178_v0 }
 0x98b   :  { %2849 = vmatprep.subr.msk.mxu0 %vm105_vm0, %v3415_v8  ;;  %2852 = vmatprep.subr.msk.mxu1 %vm105_vm0, %v3422_v30 }
 0xa5b   :  { %v2225_v52 = vpop.f32.mrb[22].mxu0  ;;  %v2296_v53 = vpop.f32.mrb[22].mxu1 }
 0xa5c   :  { %v2305_v54 = vrot.slane %v2225_v52, 5  ;;  %v2227_v55 = vpop.f32.mrb[23].mxu0  ;;  %v2298_v56 = vpop.f32.mrb[23].mxu1  ;;  %v2307_v61 = vrot.slane %v2296_v53, 5 }
 0xa5d   :  { %v2306_v33 = vrot.slane %v2227_v55, 5  ;;  %v2308_v9 = vrot.slane %v2298_v56, 5 }
 0xa5e   :  { %v2313_v57 = vadd.f32 %v2305_v54, %v3472_v7  ;;  %v2315_v30 = vadd.f32 %v2307_v61, %v3485_v4 }
 0xa5f   :  { %v2314_v37 = vadd.f32 %v2306_v33, %v3474_v10  ;;  %v2316_v8 = vadd.f32 %v2308_v9, %v3480_v14 }
 0xa60   :  { %v2837_v58 = vmul.f32 -1.442695, %v2313_v57 }
 0xa61   :  { %v2838_v5 = vmul.f32 -1.442695, %v2314_v37  ;;  %v2839_v62 = vmul.f32 -1.442695, %v2316_v8 }
 0xa62   :  { %3008 = vpow2.f32 %v2837_v58 }
 0xa63   :  { %3010 = vpow2.f32 %v2838_v5 }
 0xa64   :  { %3012 = vpow2.f32 %v2839_v62 }
 0xa65   :  { %3014 = vtanh.f32 %v2315_v30 }
 0xa6c   :  { %v3009_v63 = vpop.eup %3008 }
 0xa6d   :  { %v3011_v1 = vpop.eup %3010  ;;  %v2320_v2 = vadd.f32 1.0, %v3009_v63 }
 0xa6e   :  { %v2326_v3 = vadd.f32 1.0, %v3011_v1  ;;  %v3013_v6 = vpop.eup %3012 }
 0xa6f   :  { %3016 = vrcp.f32 %v2320_v2  ;;  %v3015_v13 = vpop.eup %3014  ;;  %v2333_v12 = vadd.f32 1.0, %v3013_v6 }
 0xa70   :  { %3018 = vrcp.f32 %v2326_v3 }
 0xa71   :  { %3020 = vrcp.f32 %v2333_v12 }
 0xa79   :  { %v3017_v15 = vpop.eup %3016 }
 0xa7a   :  { %v3019_v17 = vpop.eup %3018  ;;  %v2340_v19 = vmul.f32 %v3017_v15, %v3015_v13 }
 0xa7b   :  { %v2339_v21 = vmul.f32 %v3019_v17, %v2337_v16  ;;  %v3021_v24 = vpop.eup %3020 }
 0xa7d   :  { %v2341_v23 = vadd.f32 %v2340_v19, %v2339_v21 }
 0xa7f   :  { %3022 = vtanh.f32 %v2341_v23  ;;  %v2527_v48 = vrot.slane %v2341_v23, 7 }
 0xa89   :  { %v3023_v25 = vpop.eup %3022 }
 0xa8a   :  { %v2343_v26 = vmul.f32 %v3023_v25, %v3021_v24 }
 0xa8c   :  { %v2346_v27 = vrot.slane %v2343_v26, 3  ;;  %2344 = vst.msk [vmem:[#allocation11] sm:$0x8] %vm1021_vm5, %v2343_v26 }
 0xa8e   :  { %2842 = vmatmul.mubr.msk.f32.vlgmr.msra.gmra.mrb[24].mxu0 %vm101_vm1, %v2346_v27  ;;  %2845 = vmatmul.mubr.msk.f32.vlgmr.msra.gmra.mrb[24].mxu1 %vm101_vm1, %v2346_v27 }
 0xa8f   :  { %2850 = vmatpush1.msk.msra.mxu0 %vm105_vm0, %v3434_v59  ;;  %2603 = vmatprep.mubr.f32.mxu0 %v3178_v0 }
 0xa90   :  { %2853 = vmatpush1.msk.msra.mxu1 %vm105_vm0, %v3439_v60  ;;  %2674 = vmatprep.mubr.f32.mxu1 %v3178_v0 }
 0xb61   :  { %v2415_v29 = vpop.f32.mrb[24].mxu0  ;;  %v2486_v31 = vpop.f32.mrb[24].mxu1 }
 0xb62   :  { %v2495_v18 = vrot.slane %v2415_v29, 4  ;;  %v2417_v32 = vpop.f32.mrb[25].mxu0  ;;  %v2488_v34 = vpop.f32.mrb[25].mxu1  ;;  %v2497_v60 = vrot.slane %v2486_v31, 4 }
 0xb63   :  { %v2496_v35 = vrot.slane %v2417_v32, 4  ;;  %v2498_v59 = vrot.slane %v2488_v34, 4 }
 0xb64   :  { %v2503_v36 = vadd.f32 %v2495_v18, %v3472_v7  ;;  %v2505_v0 = vadd.f32 %v2497_v60, %v3485_v4 }
 0xb65   :  { %v2504_v38 = vadd.f32 %v2496_v35, %v3474_v10  ;;  %v2506_v39 = vadd.f32 %v2498_v59, %v3480_v14 }
 0xb66   :  { %v2846_v11 = vmul.f32 -1.442695, %v2503_v36 }
 0xb67   :  { %v2847_v28 = vmul.f32 -1.442695, %v2504_v38  ;;  %v2848_v40 = vmul.f32 -1.442695, %v2506_v39 }
 0xb68   :  { %3024 = vpow2.f32 %v2846_v11 }
 0xb69   :  { %3026 = vpow2.f32 %v2847_v28 }
 0xb6a   :  { %3028 = vpow2.f32 %v2848_v40 }
 0xb6b   :  { %3030 = vtanh.f32 %v2505_v0 }
 0xb72   :  { %v3025_v41 = vpop.eup %3024 }
 0xb73   :  { %v3027_v42 = vpop.eup %3026  ;;  %v2510_v43 = vadd.f32 1.0, %v3025_v41 }
 0xb74   :  { %v2516_v44 = vadd.f32 1.0, %v3027_v42  ;;  %v3029_v45 = vpop.eup %3028 }
 0xb75   :  { %3032 = vrcp.f32 %v2510_v43  ;;  %v3031_v46 = vpop.eup %3030  ;;  %v2523_v51 = vadd.f32 1.0, %v3029_v45 }
 0xb76   :  { %3034 = vrcp.f32 %v2516_v44 }
 0xb77   :  { %3036 = vrcp.f32 %v2523_v51 }
 0xb7f   :  { %v3033_v47 = vpop.eup %3032 }
 0xb80   :  { %v3035_v49 = vpop.eup %3034  ;;  %v2530_v50 = vmul.f32 %v3033_v47, %v3031_v46 }
 0xb81   :  { %v2529_v20 = vmul.f32 %v3035_v49, %v2527_v48  ;;  %v3037_v52 = vpop.eup %3036 }
 0xb83   :  { %v2531_v22 = vadd.f32 %v2530_v50, %v2529_v20 }
 0xb85   :  { %3038 = vtanh.f32 %v2531_v22  ;;  %v2717_v19 = vrot.slane %v2531_v22, 7 }
 0xb8f   :  { %v3039_v53 = vpop.eup %3038 }
 0xb90   :  { %v2533_v54 = vmul.f32 %v3039_v53, %v3037_v52 }
 0xb92   :  { %v2536_v55 = vrot.slane %v2533_v54, 4  ;;  %2534 = vst.msk [vmem:[#allocation11] sm:$0x10] %vm1212_vm6, %v2533_v54 }
 0xb94   :  { %2851 = vmatmul.mubr.msk.f32.vlgmr.msra.gmra.mrb[26].mxu0 %vm101_vm1, %v2536_v55  ;;  %2854 = vmatmul.mubr.msk.f32.vlgmr.msra.gmra.mrb[26].mxu1 %vm101_vm1, %v2536_v55 }
 0xc67   :  { %v2605_v56 = vpop.f32.mrb[26].mxu0  ;;  %v2676_v33 = vpop.f32.mrb[26].mxu1 }
 0xc68   :  { %v2685_v57 = vrot.slane %v2605_v56, 3  ;;  %v2607_v37 = vpop.f32.mrb[27].mxu0  ;;  %v2678_v58 = vpop.f32.mrb[27].mxu1  ;;  %v2687_v1 = vrot.slane %v2676_v33, 3 }
 0xc69   :  { %v2686_v5 = vrot.slane %v2607_v37, 3  ;;  %v2688_v30 = vrot.slane %v2678_v58, 3 }
 0xc6a   :  { %v2693_v9 = vadd.f32 %v2685_v57, %v3472_v7  ;;  %v2695_v3 = vadd.f32 %v2687_v1, %v3485_v4 }
 0xc6b   :  { %v2694_v8 = vadd.f32 %v2686_v5, %v3474_v10  ;;  %v2696_v63 = vadd.f32 %v2688_v30, %v3480_v14 }
 0xc6c   :  { %v2855_v61 = vmul.f32 -1.442695, %v2693_v9 }
 0xc6d   :  { %v2856_v62 = vmul.f32 -1.442695, %v2694_v8  ;;  %v2857_v2 = vmul.f32 -1.442695, %v2696_v63 }
 0xc6e   :  { %3040 = vpow2.f32 %v2855_v61 }
 0xc6f   :  { %3042 = vpow2.f32 %v2856_v62 }
 0xc70   :  { %3044 = vpow2.f32 %v2857_v2 }
 0xc71   :  { %3046 = vtanh.f32 %v2695_v3 }
 0xc78   :  { %v3041_v6 = vpop.eup %3040 }
 0xc79   :  { %v3043_v13 = vpop.eup %3042  ;;  %v2700_v15 = vadd.f32 1.0, %v3041_v6 }
 0xc7a   :  { %v2706_v16 = vadd.f32 1.0, %v3043_v13  ;;  %v3045_v7 = vpop.eup %3044 }
 0xc7b   :  { %3048 = vrcp.f32 %v2700_v15  ;;  %v3047_v10 = vpop.eup %3046  ;;  %v2713_v23 = vadd.f32 1.0, %v3045_v7 }
 0xc7c   :  { %3050 = vrcp.f32 %v2706_v16 }
 0xc7d   :  { %3052 = vrcp.f32 %v2713_v23 }
 0xc85   :  { %v3049_v17 = vpop.eup %3048 }
 0xc86   :  { %v3051_v12 = vpop.eup %3050  ;;  %v2720_v21 = vmul.f32 %v3049_v17, %v3047_v10 }
 0xc87   :  { %v2719_v14 = vmul.f32 %v3051_v12, %v2717_v19  ;;  %v3053_v4 = vpop.eup %3052 }
 0xc89   :  { %v2721_v24 = vadd.f32 %v2720_v21, %v2719_v14 }
 0xc8b   :  { %3054 = vtanh.f32 %v2721_v24 }
 0xc95   :  { %v3055_v25 = vpop.eup %3054 }
 0xc96   :  { %v2723_v26 = vmul.f32 %v3055_v25, %v3053_v4 }
 0xc98   :  { %2724 = vst.msk [vmem:[#allocation11] sm:$0x20] %vm1403_vm7, %v2723_v26 }
 0xc99   :  { %3155 = shalt.err (!%p3152_p8)
}
 0xc9a   :  { %s3156_s1 = scalar_lea.hbm %s3579_s7, 128 }
 0xc9b   :  { %p3157_p9 = scmp.ne.s32.totalorder %s3579_s7, %s3156_s1  ;;  %p3160_p10 = scmp.lt.u32.totalorder %s3156_s1, %s3579_s7 }
 0xc9d   :  { %p3162_p11 = pnand %p3160_p10, %p3157_p9 }
 0xc9f   :  { %3165 = shalt.err (!%p3162_p11)
}
 0xca0   :  { %2734 = dma.vmem_to_hbm [thread:$0]  %s2732_s9, 128, %s3579_s7, [#allocation5]  }
 0xca1   :  { %3172 = dma.done.wait [#allocation5], 128  }
 0xca2   :  { %3173 = vsyncadd [#allocation5], 4294967168 }
 0xca3   :  { %2738 = vsyncpa [#allocation4], 1 }
 0xca4   :  { %2739 = vsyncpa [#allocation7], 1 }
 0xca5   :  { %2740 = vsyncpa [#allocation10], 1 }
 0xca6   :  { %2741 = vsyncpa [#allocation5], 1 }

</bundles_post_ra>
